<compile_context>
chip_gen: v7x
topology: tpu7x:2x2x1
jax: 0.10.0
libtpu: 0.0.40
codegen_flags: <defaults>
</compile_context>

<pallas_src>
import jax
import jax.numpy as jnp
from jax import lax
from jax.experimental import pallas as pl
from jax.experimental.pallas import tpu as pltpu

_BN_EPS = 1e-5


# ----------------------------------------------------------------------------
# Fused Pallas kernel: (conv3x3 + BN-shift + ReLU) x 2 for one image.
# ----------------------------------------------------------------------------
def _conv_block_kernel(x_ref, w1_ref, s1_ref, w2_ref, s2_ref, o_ref, xp1, xp2):
    # x_ref : (1, H, W*C1)    bf16  input image, lane-dense rows
    # w1_ref: (3, W*C1, W*C2) bf16  banded conv1 weights (BN scale folded in)
    # s1_ref: (1, W*C2)       f32   conv1 bias + BN shift, tiled over W
    # w2_ref: (3, W*C2, W*C2) bf16  banded conv2 weights
    # s2_ref: (1, W*C2)       f32
    # o_ref : (1, H, W*C2)    f32   output image
    # xp1   : (H+2, W*C1)     f32   row-padded scratch for conv1 input
    # xp2   : (H+2, W*C2)     f32   row-padded scratch for conv2 input
    H = x_ref.shape[1]
    wc1 = xp1.shape[-1]
    wc2 = xp2.shape[-1]
    f32 = jnp.float32
    bf16 = jnp.bfloat16

    # ---- conv1: row-pad the image into scratch (dx / column padding is
    # implicit in the banded weights), then 3 MXU matmuls, f32 accumulate. ----
    xp1[0:1, :] = jnp.zeros((1, wc1), xp1.dtype)
    xp1[H + 1:H + 2, :] = jnp.zeros((1, wc1), xp1.dtype)
    xp1[1:H + 1, :] = x_ref[0].astype(xp1.dtype)

    acc = jnp.dot(xp1[0:H, :].astype(bf16), w1_ref[0],
                  preferred_element_type=f32)
    acc = acc + jnp.dot(xp1[1:H + 1, :].astype(bf16), w1_ref[1],
                        preferred_element_type=f32)
    acc = acc + jnp.dot(xp1[2:H + 2, :].astype(bf16), w1_ref[2],
                        preferred_element_type=f32)
    h1 = jnp.maximum(acc + s1_ref[...], 0.0)            # (H, W*C2) f32

    # ---- conv2: intermediate activation stays on-chip (VMEM scratch). ----
    xp2[0:1, :] = jnp.zeros((1, wc2), xp2.dtype)
    xp2[H + 1:H + 2, :] = jnp.zeros((1, wc2), xp2.dtype)
    xp2[1:H + 1, :] = h1

    acc2 = jnp.dot(xp2[0:H, :].astype(bf16), w2_ref[0],
                   preferred_element_type=f32)
    acc2 = acc2 + jnp.dot(xp2[1:H + 1, :].astype(bf16), w2_ref[1],
                          preferred_element_type=f32)
    acc2 = acc2 + jnp.dot(xp2[2:H + 2, :].astype(bf16), w2_ref[2],
                          preferred_element_type=f32)
    o_ref[0] = jnp.maximum(acc2 + s2_ref[...], 0.0).astype(o_ref.dtype)


# ----------------------------------------------------------------------------
# Banded weight construction (trace-time, tiny).
# ----------------------------------------------------------------------------
def _band_weights(wf, W):
    """(3,3,Cin,Cout) folded conv weights -> (3, W*Cin, W*Cout) banded mats.

    Band[dy][w_in*Cin+ci, w_out*Cout+co] = wf[dy, w_in-w_out+1, ci, co]
    (zero outside the band), so a dense matmul of the (H, W*Cin) activation
    rows against Band[dy] implements the dx sweep of the conv, including the
    left/right zero padding.
    """
    bands = []
    for dy in range(3):
        b = None
        for dx in range(3):
            term = jnp.kron(jnp.eye(W, W, k=1 - dx, dtype=wf.dtype), wf[dy, dx])
            b = term if b is None else b + term
        bands.append(b)
    return jnp.stack(bands)                               # (3, W*Cin, W*Cout)


# ----------------------------------------------------------------------------
# Forward pass (ConvBlock)
# ----------------------------------------------------------------------------
def conv_block_forward(params, x_nchw):
    """ConvBlock forward: x (N, C_in, H, W) f32 -> (N, C_out, H, W) f32."""
    N, C1, H, W = x_nchw.shape
    C2 = params["wf1"].shape[-1]
    WC1, WC2 = W * C1, W * C2

    # NCHW -> lane-dense (N, H, W*C1) bf16 slab (one small XLA relayout).
    x = jnp.transpose(x_nchw, (0, 2, 3, 1)).reshape(N, H, WC1).astype(jnp.bfloat16)

    w1b = _band_weights(params["wf1"], W).astype(jnp.bfloat16)   # (3, WC1, WC2)
    w2b = _band_weights(params["wf2"], W).astype(jnp.bfloat16)   # (3, WC2, WC2)
    s1 = jnp.tile(params["sh1"].astype(jnp.float32), W).reshape(1, WC2)
    s2 = jnp.tile(params["sh2"].astype(jnp.float32), W).reshape(1, WC2)

    out = pl.pallas_call(
        _conv_block_kernel,
        out_shape=jax.ShapeDtypeStruct((N, H, WC2), jnp.float32),
        grid_spec=pltpu.PrefetchScalarGridSpec(
            num_scalar_prefetch=0,
            grid=(N,),
            in_specs=[
                pl.BlockSpec((1, H, WC1), lambda n: (n, 0, 0)),
                pl.BlockSpec((3, WC1, WC2), lambda n: (0, 0, 0)),
                pl.BlockSpec((1, WC2), lambda n: (0, 0)),
                pl.BlockSpec((3, WC2, WC2), lambda n: (0, 0, 0)),
                pl.BlockSpec((1, WC2), lambda n: (0, 0)),
            ],
            out_specs=pl.BlockSpec((1, H, WC2), lambda n: (n, 0, 0)),
            scratch_shapes=[
                pltpu.VMEM((H + 2, WC1), jnp.float32),
                pltpu.VMEM((H + 2, WC2), jnp.float32),
            ],
        ),
        compiler_params=pltpu.CompilerParams(
            dimension_semantics=("parallel",),
        ),
    )(x, w1b, s1, w2b, s2)

    return jnp.transpose(out.reshape(N, H, W, C2), (0, 3, 1, 2))  # -> NCHW


# ----------------------------------------------------------------------------
# Parameters (deterministic synthetic init) with BN folded into the conv.
# ----------------------------------------------------------------------------
def _fold_bn(w, b):
    # TODO(synk): BatchNorm is folded with its init running stats (mean=0,
    # var=1, gamma=1, beta=0), i.e. eval-mode semantics; train-mode batch
    # statistics are not computed.
    cout = w.shape[-1]
    gamma = jnp.ones((cout,), jnp.float32)
    beta = jnp.zeros((cout,), jnp.float32)
    mean = jnp.zeros((cout,), jnp.float32)
    var = jnp.ones((cout,), jnp.float32)
    scale = gamma / jnp.sqrt(var + _BN_EPS)
    w_folded = w * scale                      # fold scale into weights (Cout axis)
    shift = beta + scale * (b - mean)         # fold conv bias + BN shift
    return w_folded, shift


def init_conv_block_params(key, ch_in, ch_out):
    k1, k2, k3, k4 = jax.random.split(key, 4)

    def conv_w(wk, bk, cin, cout):
        fan_in = 9 * cin
        w = jax.random.normal(wk, (3, 3, cin, cout), jnp.float32) / jnp.sqrt(fan_in)
        b = 0.01 * jax.random.normal(bk, (cout,), jnp.float32)
        return w, b

    w1, b1 = conv_w(k1, k2, ch_in, ch_out)
    w2, b2 = conv_w(k3, k4, ch_out, ch_out)
    wf1, sh1 = _fold_bn(w1, b1)
    wf2, sh2 = _fold_bn(w2, b2)
    return dict(wf1=wf1, sh1=sh1, wf2=wf2, sh2=sh2)


# ----------------------------------------------------------------------------
# Pure-JAX references.
# ----------------------------------------------------------------------------
def conv_block_reference(params, x_nchw, compute_dtype=jnp.bfloat16):
    """lax.conv reference; compute_dtype=bf16 matches the kernel's numerics,
    compute_dtype=f32 is the 'true' full-precision ConvBlock."""
    x = jnp.transpose(x_nchw, (0, 2, 3, 1))

    def layer(xin, wf, sh):
        y = lax.conv_general_dilated(
            xin.astype(compute_dtype), wf.astype(compute_dtype),
            window_strides=(1, 1), padding=((1, 1), (1, 1)),
            dimension_numbers=("NHWC", "HWIO", "NHWC"),
            preferred_element_type=jnp.float32)
        return jnp.maximum(y + sh.astype(jnp.float32), 0.0)

    h = layer(x, params["wf1"], params["sh1"])
    y = layer(h, params["wf2"], params["sh2"])
    return jnp.transpose(y, (0, 3, 1, 2))


if __name__ == "__main__":
    key = jax.random.PRNGKey(0)
    pkey, xkey = jax.random.split(key)

    CH_IN, CH_OUT, HW, BATCH = 4, 32, 16, 2
    params = init_conv_block_params(pkey, CH_IN, CH_OUT)
    x = jax.random.normal(xkey, (BATCH, CH_IN, HW, HW), jnp.float32)   # NCHW

    fwd = jax.jit(conv_block_forward)
    out = jax.block_until_ready(fwd(params, x))

    assert out.shape == (BATCH, CH_OUT, HW, HW), out.shape
    assert bool(jnp.all(jnp.isfinite(out)))

    # Check 1: reference with identical precision choices (bf16 MXU operands,
    # f32 accumulation) -- tight tolerance, validates the kernel itself.
    ref_bf16 = conv_block_reference(params, x, compute_dtype=jnp.bfloat16)
    assert bool(jnp.allclose(out, ref_bf16, atol=1e-2, rtol=1e-2)), (
        float(jnp.max(jnp.abs(out - ref_bf16))))

    # Check 2: full-f32 ConvBlock -- bounds the bf16 quantization drift of the
    # kernel's compute dtype (looser tolerance by construction).
    ref_f32 = conv_block_reference(params, x, compute_dtype=jnp.float32)
    assert bool(jnp.allclose(out, ref_f32, atol=1.5e-1, rtol=5e-2)), (
        float(jnp.max(jnp.abs(out - ref_f32))))

    print("KERNEL_OK")
</pallas_src>

<mosaic_0001>
module attributes {stable_mosaic.version = 11 : i64} {
  func.func @_conv_block_kernel(%arg0: i32, %arg1: memref<1x16x64xbf16, #tpu.memory_space<vmem>>, %arg2: memref<3x64x512xbf16, #tpu.memory_space<vmem>>, %arg3: memref<1x512xf32, #tpu.memory_space<vmem>>, %arg4: memref<3x512x512xbf16, #tpu.memory_space<vmem>>, %arg5: memref<1x512xf32, #tpu.memory_space<vmem>>, %arg6: memref<1x16x512xf32, #tpu.memory_space<vmem>>, %arg7: memref<18x64xf32, #tpu.memory_space<vmem>>, %arg8: memref<18x512xf32, #tpu.memory_space<vmem>>) attributes {dimension_semantics = [#tpu.dimension_semantics<parallel>], iteration_bounds = array<i64: 2>, scalar_prefetch = 0 : i64, scratch_operands = 2 : i64, tpu.core_type = #tpu.core_type<tc>, window_params = [{transform_indices = @transform_0, window_bounds = array<i64: 1, 16, 64>}, {pipeline_mode = #tpu.pipeline_mode<synchronous>, transform_indices = @transform_1, window_bounds = array<i64: 3, 64, 512>}, {pipeline_mode = #tpu.pipeline_mode<synchronous>, transform_indices = @transform_2, window_bounds = array<i64: 1, 512>}, {pipeline_mode = #tpu.pipeline_mode<synchronous>, transform_indices = @transform_3, window_bounds = array<i64: 3, 512, 512>}, {pipeline_mode = #tpu.pipeline_mode<synchronous>, transform_indices = @transform_4, window_bounds = array<i64: 1, 512>}, {transform_indices = @transform_5, window_bounds = array<i64: 1, 16, 512>}]} {
    %cst = arith.constant 0.000000e+00 : f32
    %0 = vector.broadcast %cst : f32 to vector<1x64xf32>
    %c0 = arith.constant 0 : index
    %c0_0 = arith.constant 0 : index
    %1 = vector.load %arg7[%c0, %c0_0] : memref<18x64xf32, #tpu.memory_space<vmem>>, vector<1x64xf32>
    tpu.vector_store %arg7[%c0, %c0_0], %0 {strides = array<i32>} : memref<18x64xf32, #tpu.memory_space<vmem>>, vector<1x64xf32>,
    %cst_1 = arith.constant 0.000000e+00 : f32
    %2 = vector.broadcast %cst_1 : f32 to vector<1x64xf32>
    %c17 = arith.constant 17 : index
    %c0_2 = arith.constant 0 : index
    %3 = vector.load %arg7[%c17, %c0_2] : memref<18x64xf32, #tpu.memory_space<vmem>>, vector<1x64xf32>
    tpu.vector_store %arg7[%c17, %c0_2], %2 {strides = array<i32>} : memref<18x64xf32, #tpu.memory_space<vmem>>, vector<1x64xf32>,
    %c0_3 = arith.constant 0 : index
    %c0_4 = arith.constant 0 : index
    %c0_5 = arith.constant 0 : index
    %4 = vector.load %arg1[%c0_3, %c0_4, %c0_5] : memref<1x16x64xbf16, #tpu.memory_space<vmem>>, vector<1x16x64xbf16>
    %5 = vector.shape_cast %4 : vector<1x16x64xbf16> to vector<16x64xbf16>
    %6 = arith.extf %5 : vector<16x64xbf16> to vector<16x64xf32>
    %c1 = arith.constant 1 : index
    %c0_6 = arith.constant 0 : index
    %7 = vector.load %arg7[%c1, %c0_6] : memref<18x64xf32, #tpu.memory_space<vmem>>, vector<16x64xf32>
    tpu.vector_store %arg7[%c1, %c0_6], %6 {strides = array<i32>} : memref<18x64xf32, #tpu.memory_space<vmem>>, vector<16x64xf32>,
    %c0_7 = arith.constant 0 : index
    %c0_8 = arith.constant 0 : index
    %8 = vector.load %arg7[%c0_7, %c0_8] : memref<18x64xf32, #tpu.memory_space<vmem>>, vector<16x64xf32>
    %9 = arith.truncf %8 : vector<16x64xf32> to vector<16x64xbf16>
    %c0_9 = arith.constant 0 : index
    %c0_10 = arith.constant 0 : index
    %c0_11 = arith.constant 0 : index
    %10 = vector.load %arg2[%c0_9, %c0_10, %c0_11] : memref<3x64x512xbf16, #tpu.memory_space<vmem>>, vector<1x64x512xbf16>
    %11 = vector.shape_cast %10 : vector<1x64x512xbf16> to vector<64x512xbf16>
    %cst_12 = arith.constant dense<0.000000e+00> : vector<16x512xf32>
    %12 = tpu.matmul %9, %11, %cst_12 {dimension_numbers = #tpu.dot_dimension_numbers<[1], [0], [0], [1], [0, 0, 1, 1], [], []>} : vector<16x64xbf16>, vector<64x512xbf16>, vector<16x512xf32> -> vector<16x512xf32>
    %c1_13 = arith.constant 1 : index
    %c0_14 = arith.constant 0 : index
    %13 = vector.load %arg7[%c1_13, %c0_14] : memref<18x64xf32, #tpu.memory_space<vmem>>, vector<16x64xf32>
    %14 = arith.truncf %13 : vector<16x64xf32> to vector<16x64xbf16>
    %c1_15 = arith.constant 1 : index
    %c0_16 = arith.constant 0 : index
    %c0_17 = arith.constant 0 : index
    %15 = vector.load %arg2[%c1_15, %c0_16, %c0_17] : memref<3x64x512xbf16, #tpu.memory_space<vmem>>, vector<1x64x512xbf16>
    %16 = vector.shape_cast %15 : vector<1x64x512xbf16> to vector<64x512xbf16>
    %cst_18 = arith.constant dense<0.000000e+00> : vector<16x512xf32>
    %17 = tpu.matmul %14, %16, %cst_18 {dimension_numbers = #tpu.dot_dimension_numbers<[1], [0], [0], [1], [0, 0, 1, 1], [], []>} : vector<16x64xbf16>, vector<64x512xbf16>, vector<16x512xf32> -> vector<16x512xf32>
    %18 = arith.addf %12, %17 : vector<16x512xf32>
    %c2 = arith.constant 2 : index
    %c0_19 = arith.constant 0 : index
    %19 = vector.load %arg7[%c2, %c0_19] : memref<18x64xf32, #tpu.memory_space<vmem>>, vector<16x64xf32>
    %20 = arith.truncf %19 : vector<16x64xf32> to vector<16x64xbf16>
    %c2_20 = arith.constant 2 : index
    %c0_21 = arith.constant 0 : index
    %c0_22 = arith.constant 0 : index
    %21 = vector.load %arg2[%c2_20, %c0_21, %c0_22] : memref<3x64x512xbf16, #tpu.memory_space<vmem>>, vector<1x64x512xbf16>
    %22 = vector.shape_cast %21 : vector<1x64x512xbf16> to vector<64x512xbf16>
    %cst_23 = arith.constant dense<0.000000e+00> : vector<16x512xf32>
    %23 = tpu.matmul %20, %22, %cst_23 {dimension_numbers = #tpu.dot_dimension_numbers<[1], [0], [0], [1], [0, 0, 1, 1], [], []>} : vector<16x64xbf16>, vector<64x512xbf16>, vector<16x512xf32> -> vector<16x512xf32>
    %24 = arith.addf %18, %23 : vector<16x512xf32>
    %c0_24 = arith.constant 0 : index
    %c0_25 = arith.constant 0 : index
    %25 = vector.load %arg3[%c0_24, %c0_25] : memref<1x512xf32, #tpu.memory_space<vmem>>, vector<1x512xf32>
    %26 = vector.broadcast %25 : vector<1x512xf32> to vector<16x512xf32>
    %27 = arith.addf %24, %26 : vector<16x512xf32>
    %cst_26 = arith.constant 0.000000e+00 : f32
    %28 = vector.broadcast %cst_26 : f32 to vector<16x512xf32>
    %29 = arith.maximumf %27, %28 : vector<16x512xf32>
    %cst_27 = arith.constant 0.000000e+00 : f32
    %30 = vector.broadcast %cst_27 : f32 to vector<1x512xf32>
    %c0_28 = arith.constant 0 : index
    %c0_29 = arith.constant 0 : index
    %31 = vector.load %arg8[%c0_28, %c0_29] : memref<18x512xf32, #tpu.memory_space<vmem>>, vector<1x512xf32>
    tpu.vector_store %arg8[%c0_28, %c0_29], %30 {strides = array<i32>} : memref<18x512xf32, #tpu.memory_space<vmem>>, vector<1x512xf32>,
    %cst_30 = arith.constant 0.000000e+00 : f32
    %32 = vector.broadcast %cst_30 : f32 to vector<1x512xf32>
    %c17_31 = arith.constant 17 : index
    %c0_32 = arith.constant 0 : index
    %33 = vector.load %arg8[%c17_31, %c0_32] : memref<18x512xf32, #tpu.memory_space<vmem>>, vector<1x512xf32>
    tpu.vector_store %arg8[%c17_31, %c0_32], %32 {strides = array<i32>} : memref<18x512xf32, #tpu.memory_space<vmem>>, vector<1x512xf32>,
    %c1_33 = arith.constant 1 : index
    %c0_34 = arith.constant 0 : index
    %34 = vector.load %arg8[%c1_33, %c0_34] : memref<18x512xf32, #tpu.memory_space<vmem>>, vector<16x512xf32>
    tpu.vector_store %arg8[%c1_33, %c0_34], %29 {strides = array<i32>} : memref<18x512xf32, #tpu.memory_space<vmem>>, vector<16x512xf32>,
    %c0_35 = arith.constant 0 : index
    %c0_36 = arith.constant 0 : index
    %35 = vector.load %arg8[%c0_35, %c0_36] : memref<18x512xf32, #tpu.memory_space<vmem>>, vector<16x512xf32>
    %36 = arith.truncf %35 : vector<16x512xf32> to vector<16x512xbf16>
    %c0_37 = arith.constant 0 : index
    %c0_38 = arith.constant 0 : index
    %c0_39 = arith.constant 0 : index
    %37 = vector.load %arg4[%c0_37, %c0_38, %c0_39] : memref<3x512x512xbf16, #tpu.memory_space<vmem>>, vector<1x512x512xbf16>
    %38 = vector.shape_cast %37 : vector<1x512x512xbf16> to vector<512x512xbf16>
    %cst_40 = arith.constant dense<0.000000e+00> : vector<16x512xf32>
    %39 = tpu.matmul %36, %38, %cst_40 {dimension_numbers = #tpu.dot_dimension_numbers<[1], [0], [0], [1], [0, 0, 1, 1], [], []>} : vector<16x512xbf16>, vector<512x512xbf16>, vector<16x512xf32> -> vector<16x512xf32>
    %c1_41 = arith.constant 1 : index
    %c0_42 = arith.constant 0 : index
    %40 = vector.load %arg8[%c1_41, %c0_42] : memref<18x512xf32, #tpu.memory_space<vmem>>, vector<16x512xf32>
    %41 = arith.truncf %40 : vector<16x512xf32> to vector<16x512xbf16>
    %c1_43 = arith.constant 1 : index
    %c0_44 = arith.constant 0 : index
    %c0_45 = arith.constant 0 : index
    %42 = vector.load %arg4[%c1_43, %c0_44, %c0_45] : memref<3x512x512xbf16, #tpu.memory_space<vmem>>, vector<1x512x512xbf16>
    %43 = vector.shape_cast %42 : vector<1x512x512xbf16> to vector<512x512xbf16>
    %cst_46 = arith.constant dense<0.000000e+00> : vector<16x512xf32>
    %44 = tpu.matmul %41, %43, %cst_46 {dimension_numbers = #tpu.dot_dimension_numbers<[1], [0], [0], [1], [0, 0, 1, 1], [], []>} : vector<16x512xbf16>, vector<512x512xbf16>, vector<16x512xf32> -> vector<16x512xf32>
    %45 = arith.addf %39, %44 : vector<16x512xf32>
    %c2_47 = arith.constant 2 : index
    %c0_48 = arith.constant 0 : index
    %46 = vector.load %arg8[%c2_47, %c0_48] : memref<18x512xf32, #tpu.memory_space<vmem>>, vector<16x512xf32>
    %47 = arith.truncf %46 : vector<16x512xf32> to vector<16x512xbf16>
    %c2_49 = arith.constant 2 : index
    %c0_50 = arith.constant 0 : index
    %c0_51 = arith.constant 0 : index
    %48 = vector.load %arg4[%c2_49, %c0_50, %c0_51] : memref<3x512x512xbf16, #tpu.memory_space<vmem>>, vector<1x512x512xbf16>
    %49 = vector.shape_cast %48 : vector<1x512x512xbf16> to vector<512x512xbf16>
    %cst_52 = arith.constant dense<0.000000e+00> : vector<16x512xf32>
    %50 = tpu.matmul %47, %49, %cst_52 {dimension_numbers = #tpu.dot_dimension_numbers<[1], [0], [0], [1], [0, 0, 1, 1], [], []>} : vector<16x512xbf16>, vector<512x512xbf16>, vector<16x512xf32> -> vector<16x512xf32>
    %51 = arith.addf %45, %50 : vector<16x512xf32>
    %c0_53 = arith.constant 0 : index
    %c0_54 = arith.constant 0 : index
    %52 = vector.load %arg5[%c0_53, %c0_54] : memref<1x512xf32, #tpu.memory_space<vmem>>, vector<1x512xf32>
    %53 = vector.broadcast %52 : vector<1x512xf32> to vector<16x512xf32>
    %54 = arith.addf %51, %53 : vector<16x512xf32>
    %cst_55 = arith.constant 0.000000e+00 : f32
    %55 = vector.broadcast %cst_55 : f32 to vector<16x512xf32>
    %56 = arith.maximumf %54, %55 : vector<16x512xf32>
    %c0_56 = arith.constant 0 : index
    %c0_57 = arith.constant 0 : index
    %c0_58 = arith.constant 0 : index
    %57 = vector.load %arg6[%c0_56, %c0_57, %c0_58] : memref<1x16x512xf32, #tpu.memory_space<vmem>>, vector<1x16x512xf32>
    %58 = vector.shape_cast %57 : vector<1x16x512xf32> to vector<16x512xf32>
    %59 = vector.shape_cast %56 : vector<16x512xf32> to vector<1x16x512xf32>
    tpu.vector_store %arg6[%c0_56, %c0_57, %c0_58], %59 {strides = array<i32>} : memref<1x16x512xf32, #tpu.memory_space<vmem>>, vector<1x16x512xf32>,
    return
  }
  func.func @transform_0(%arg0: i32) -> (i32, i32, i32) {
    %c0_i32 = arith.constant 0 : i32
    %c0_i32_0 = arith.constant 0 : i32
    %c0_i32_1 = arith.constant 0 : i32
    return %arg0, %c0_i32, %c0_i32_0 : i32, i32, i32
  }
  func.func @transform_1(%arg0: i32) -> (i32, i32, i32) {
    %c0_i32 = arith.constant 0 : i32
    %c0_i32_0 = arith.constant 0 : i32
    %c0_i32_1 = arith.constant 0 : i32
    %c0_i32_2 = arith.constant 0 : i32
    return %c0_i32, %c0_i32_0, %c0_i32_1 : i32, i32, i32
  }
  func.func @transform_2(%arg0: i32) -> (i32, i32) {
    %c0_i32 = arith.constant 0 : i32
    %c0_i32_0 = arith.constant 0 : i32
    %c0_i32_1 = arith.constant 0 : i32
    return %c0_i32, %c0_i32_0 : i32, i32
  }
  func.func @transform_3(%arg0: i32) -> (i32, i32, i32) {
    %c0_i32 = arith.constant 0 : i32
    %c0_i32_0 = arith.constant 0 : i32
    %c0_i32_1 = arith.constant 0 : i32
    %c0_i32_2 = arith.constant 0 : i32
    return %c0_i32, %c0_i32_0, %c0_i32_1 : i32, i32, i32
  }
  func.func @transform_4(%arg0: i32) -> (i32, i32) {
    %c0_i32 = arith.constant 0 : i32
    %c0_i32_0 = arith.constant 0 : i32
    %c0_i32_1 = arith.constant 0 : i32
    return %c0_i32, %c0_i32_0 : i32, i32
  }
  func.func @transform_5(%arg0: i32) -> (i32, i32, i32) {
    %c0_i32 = arith.constant 0 : i32
    %c0_i32_0 = arith.constant 0 : i32
    %c0_i32_1 = arith.constant 0 : i32
    return %arg0, %c0_i32, %c0_i32_0 : i32, i32, i32
  }
}

</mosaic_0001>

<bundles_post_ra>
// kernel: tile.13
= control target key start
LH: loop header
LB: loop body
LE: loop exit
PB: predicated region body
PF: predicated region fallthrough
CT: control target
= control target key end

     0   :  { %s28_s0 = inlined_call_operand.vmem [shape: f32[32], index: 0, kind: input, shape index: {}]   ;;  %s29_s1 = inlined_call_operand.vmem [shape: f32[16,32], index: 1, kind: output, shape index: {}]  }
   0x1   :  { %v4_v0 = vld [vmem:[%s28_s0] ss:$0 sm:$0xff] }
   0x2   :  { %5 = vst [vmem:[%s29_s1] sm:$0xff] %v4_v0  ;;  %8 = vst [vmem:[%s29_s1 + $0x8] sm:$0xff] %v4_v0 }

// kernel: tile.14
= control target key start
LH: loop header
LB: loop body
LE: loop exit
PB: predicated region body
PF: predicated region fallthrough
CT: control target
= control target key end

     0   :  { %s57_s8 = smov 96   ;;  %vm3_vm0 = vcmask 261120   ;;  %s59_s15 = smov 64   ;;  %vm9_vm1 = vcmask 1048320   ;;  %vm15_vm2 = vcmask 785920   ;;  %vm21_vm3 = vcmask 523520   ;;  %s94_s0 = inlined_call_operand.vmem [shape: f32[16,32], index: 0, kind: input, shape index: {}]   ;;  %s95_s1 = inlined_call_operand.vmem [shape: f32[1,512], index: 1, kind: output, shape index: {}]  }
   0x1   :  { %v48_v0 = vld [vmem:[%s94_s0 + $0x3] ss:$4 sm:$0xf]   ;;  %v49_v1 = vld [vmem:[%s94_s0 + $0x2] ss:$4 sm:$0xf]  }
   0x2   :  { %7 = vrot.lane.b32.xlu0 %v48_v0, %s57_s8  ;;  %v50_v2 = vld [vmem:[%s94_s0 + $0x1] ss:$4 sm:$0xf]   ;;  %v2_v3 = vld [vmem:[%s94_s0] ss:$4 sm:$0xf]  }
   0x3   :  { %s58_s0 = smov 32   ;;  %4 = vst.msk [vmem:[#allocation0] ss:$8 sm:$0xf] %vm3_vm0, %v2_v3  }
   0x4   :  { %19 = vrot.lane.b32.xlu1 %v50_v2, %s58_s0 }
   0x6   :  { %13 = vrot.lane.b32.xlu0 %v49_v1, %s59_s15 }
  0x74   :  { %v8_v4 = vpop.permute.xlu0 %7  }
  0x75   :  { %10 = vst.msk [vmem:[#allocation0] ss:$8 sm:$0xf] %vm9_vm1, %v8_v4  }
  0x76   :  { %v20_v5 = vpop.permute.xlu1 %19  }
  0x78   :  { %v14_v6 = vpop.permute.xlu0 %13  }
  0x79   :  { %16 = vst.msk [vmem:[#allocation0] ss:$8 sm:$0xf] %vm15_vm2, %v14_v6  }
  0x7a   :  { %22 = vst.msk [vmem:[#allocation0] ss:$8 sm:$0xf] %vm21_vm3, %v20_v5  }
  0x81   :  { %v26_v7 = vld [vmem:[#allocation0] sm:$0x1]  ;;  %v30_v8 = vld [vmem:[#allocation0 + $0x8] sm:$0x1]  ;;  %v35_v9 = vld [vmem:[#allocation0 + $0x10] sm:$0x1] }
  0x82   :  { %28 = vst [vmem:[%s95_s1] sm:$0x1] %v26_v7  ;;  %51 = vst [vmem:[%s95_s1 + $0x1] sm:$0x1] %v30_v8  ;;  %v41_v10 = vld [vmem:[#allocation0 + $0x18] sm:$0x1] }
  0x83   :  { %52 = vst [vmem:[%s95_s1 + $0x2] sm:$0x1] %v35_v9  ;;  %53 = vst [vmem:[%s95_s1 + $0x3] sm:$0x1] %v41_v10 }

// kernel: conv_block_forward.1
= control target key start
LH: loop header
LB: loop body
LE: loop exit
PB: predicated region body
PF: predicated region fallthrough
CT: control target
= control target key end

     0   :  { %s5453_s18 = smov 0   ;;  %s6860_s0 = inlined_call_operand.vmem [shape: bf16[2,16,64], index: 0, kind: input, shape index: {}]   ;;  %s6861_s1 = inlined_call_operand.vmem [shape: bf16[3,64,512], index: 1, kind: input, shape index: {}]   ;;  %s6862_s2 = inlined_call_operand.vmem [shape: f32[1,512], index: 2, kind: input, shape index: {}]   ;;  %s6863_s3 = inlined_call_operand.vmem [shape: bf16[3,512,512], index: 3, kind: input, shape index: {}]   ;;  %s6864_s4 = inlined_call_operand.vmem [shape: f32[1,512], index: 4, kind: input, shape index: {}]   ;;  %s6865_s5 = inlined_call_operand.vmem [shape: f32[2,16,512], index: 5, kind: output, shape index: {}]  }
   0x1 LB: > { %s3955_s19 = sadd.s32 4294967295, %s5419_s18   ;;  %p3959_p0 = scmp.ge.s32.totalorder %s5419_s18, 1  ;;  %s5419_s18 = sphi %s5453_s18, %s15_s18  }
   0x2   : > { %p187_p1 = scmp.lt.s32.totalorder %s5419_s18, 3 }
   0x4   : > { %p188_p2 = pnand %p3959_p0, %p187_p1 }
   0x5   : > { %v4764_v0 = vld [vmem:[%s6861_s1 + $0x84] ss:$16 sps:$4 sm:$0xff] (!%p188_p2)   ;;  %p215_p3 = scmp.lt.s32.totalorder (!%p188_p2), %s3955_s19, 1  ;;  %v4766_v1 = vld [vmem:[%s6861_s1 + $0x80] ss:$16 sps:$4 sm:$0xff] (!%p188_p2)   ;;  %v5421_v2 = vmov (!%p188_p2), 0  }
   0x6   : > { %191 = sbr.rel (%p188_p2) target bundleno = 839 (0x347), region = 40  ;;  %390 = vmatprep.mubr.bf16.mxu0 (!%p188_p2), %v5421_v2  ;;  %vm226_vm0 = vcmask (!%p188_p2), 516096   ;;  %433 = vmatprep.mubr.bf16.mxu1 (!%p188_p2), %v5421_v2  ;;  %v4767_v3 = vld [vmem:[%s6861_s1 + $0xa4] ss:$16 sps:$4 sm:$0xff] (!%p188_p2)   ;;  %v4769_v4 = vld [vmem:[%s6861_s1 + $0xa0] ss:$16 sps:$4 sm:$0xff] (!%p188_p2)  }
   0x7   : > { %358 = vmatprep.subr.bf16.mxu0 (!%p188_p2), %v4764_v0  ;;  %v4770_v5 = vld [vmem:[%s6861_s1 + $0xc4] ss:$16 sps:$4 sm:$0xff] (!%p188_p2)   ;;  %v5422_v6 = vmov (!%p188_p2), 0.0   ;;  %vm233_vm1 = vcmask (!%p188_p2), 523264   ;;  %v4772_v8 = vld [vmem:[%s6861_s1 + $0xc0] ss:$16 sps:$4 sm:$0xff] (!%p188_p2)  }
   0x8   : > { %359 = vmatpush1.bf16.msra.mxu0 (!%p188_p2), %v4766_v1  ;;  %227 = vst.msk [vmem:[#allocation2] sm:$0x1] (!%p188_p2), %vm226_vm0, %v5422_v6  ;;  %228 = vst.msk [vmem:[#allocation2 + $0x11] sm:$0x1] (!%p188_p2), %vm226_vm0, %v5422_v6  ;;  %v4773_v11 = vld [vmem:[%s6861_s1 + $0xe4] ss:$16 sps:$4 sm:$0xff] (!%p188_p2)  }
   0x9   : > { %360 = vmatprep.subr.bf16.mxu0 (!%p188_p2), %v4767_v3  ;;  %v4785_v12 = vld [vmem:[%s6861_s1 + $0x8c] ss:$16 sps:$4 sm:$0xff] (!%p188_p2)   ;;  %v4787_v13 = vld [vmem:[%s6861_s1 + $0x88] ss:$16 sps:$4 sm:$0xff] (!%p188_p2)   ;;  %v4775_v14 = vld [vmem:[%s6861_s1 + $0xe0] ss:$16 sps:$4 sm:$0xff] (!%p188_p2)  }
   0xa   : > { %v4778_v15 = vld [vmem:[%s6861_s1 + $0x4] ss:$16 sps:$4 sm:$0xff] (!%p188_p2)   ;;  %401 = vmatprep.subr.bf16.mxu1 (!%p188_p2), %v4785_v12  ;;  %v4791_v16 = vld [vmem:[%s6861_s1 + $0xac] ss:$16 sps:$4 sm:$0xff] (!%p188_p2)   ;;  %v4793_v17 = vld [vmem:[%s6861_s1 + $0xa8] ss:$16 sps:$4 sm:$0xff] (!%p188_p2)  }
   0xb   : > { %402 = vmatpush1.bf16.msra.mxu1 (!%p188_p2), %v4787_v13  ;;  %v4797_v18 = vld [vmem:[%s6861_s1 + $0xcc] ss:$16 sps:$4 sm:$0xff] (!%p188_p2)   ;;  %v4776_v19 = vld [vmem:[%s6861_s1] ss:$16 sps:$4 sm:$0xff] (!%p188_p2)   ;;  %v4781_v23 = vld [vmem:[%s6861_s1 + $0x24] ss:$16 sps:$4 sm:$0xff] (!%p188_p2)  }
   0xc   : > { %361 = vmatpush1.bf16.msra.mxu0 (!%p188_p2), %v4769_v4  ;;  %403 = vmatprep.subr.bf16.mxu1 (!%p188_p2), %v4791_v16  ;;  %v4799_v24 = vld [vmem:[%s6861_s1 + $0xc8] ss:$16 sps:$4 sm:$0xff] (!%p188_p2)   ;;  %v4803_v25 = vld [vmem:[%s6861_s1 + $0xec] ss:$16 sps:$4 sm:$0xff] (!%p188_p2)   ;;  %v4779_v26 = vld [vmem:[%s6861_s1 + $0x20] ss:$16 sps:$4 sm:$0xff] (!%p188_p2)  }
   0xd   : > { %s6867_s19 = smov (!%p215_p3, %s3955_s19), 1  ;;  %362 = vmatprep.subr.bf16.mxu0 %v4770_v5  ;;  %v4784_v27 = vld [vmem:[%s6861_s1 + $0x44] ss:$16 sps:$4 sm:$0xff]   ;;  %v4805_v28 = vld [vmem:[%s6861_s1 + $0xe8] ss:$16 sps:$4 sm:$0xff]   ;;  %vm865_vm3 = vcmask 1040384  }
   0xe   : > { %s4692_s30 = sshll.u32 %s6867_s19, 3  ;;  %v4811_v29 = vld [vmem:[%s6861_s1 + $0xc] ss:$16 sps:$4 sm:$0xff]   ;;  %v4782_v30 = vld [vmem:[%s6861_s1 + $0x40] ss:$16 sps:$4 sm:$0xff]   ;;  %vm3017_vm5 = vcmask 1046528  }
   0xf   : > { %s219_s8 = scalar_lea.vmem %s6860_s0, %s4692_s30  ;;  %404 = vmatpush1.bf16.msra.mxu1 %v4793_v17  ;;  %v4790_v31 = vld [vmem:[%s6861_s1 + $0x64] ss:$16 sps:$4 sm:$0xff]   ;;  %v4809_v32 = vld [vmem:[%s6861_s1 + $0x8] ss:$16 sps:$4 sm:$0xff]   ;;  %v4817_v33 = vld [vmem:[%s6861_s1 + $0x2c] ss:$16 sps:$4 sm:$0xff]  }
  0x10   : > { %v4695_v7 = vld [vmem:[%s219_s8] sm:$0xff]   ;;  %363 = vmatpush1.bf16.msra.mxu0 %v4772_v8  ;;  %405 = vmatprep.subr.bf16.mxu1 %v4797_v18  ;;  %v4815_v38 = vld [vmem:[%s6861_s1 + $0x28] ss:$16 sps:$4 sm:$0xff]   ;;  %v4820_v39 = vld [vmem:[%s6861_s1 + $0x4c] ss:$16 sps:$4 sm:$0xff]   ;;  %s4693_s16 = sshll.u32 %s6867_s19, 6 }
  0x11   : > { %v4696_v9 = vunpack.c.l.bf16 %v4695_v7  ;;  %v4697_v10 = vunpack.c.h.bf16 %v4695_v7  ;;  %364 = vmatprep.subr.bf16.mxu0 %v4773_v11  ;;  %v4788_v34 = vld [vmem:[%s6861_s1 + $0x60] ss:$16 sps:$4 sm:$0xff]   ;;  %v4796_v35 = vld [vmem:[%s6861_s1 + $0x104] ss:$16 sps:$4 sm:$0xff]   ;;  %v4818_v43 = vld [vmem:[%s6861_s1 + $0x48] ss:$16 sps:$4 sm:$0xff]   ;;  %s224_s21 = scalar_lea.vmem %s6865_s5, %s4693_s16 }
  0x12   : > { %v4794_v41 = vld [vmem:[%s6861_s1 + $0x100] ss:$16 sps:$4 sm:$0xff]   ;;  %v4802_v42 = vld [vmem:[%s6861_s1 + $0x124] ss:$16 sps:$4 sm:$0xff]   ;;  %v4823_v44 = vld [vmem:[%s6861_s1 + $0x6c] ss:$16 sps:$4 sm:$0xff]  }
  0x13   : > { %234 = vst.msk [vmem:[#allocation2 + $0x1] sm:$0xff] %vm233_vm1, %v4696_v9  ;;  %235 = vst.msk [vmem:[#allocation2 + $0x9] sm:$0xff] %vm233_vm1, %v4697_v10  ;;  %406 = vmatpush1.bf16.msra.mxu1 %v4799_v24  ;;  %v4800_v45 = vld [vmem:[%s6861_s1 + $0x120] ss:$16 sps:$4 sm:$0xff]   ;;  %v4808_v46 = vld [vmem:[%s6861_s1 + $0x144] ss:$16 sps:$4 sm:$0xff]  }
  0x14   : > { %365 = vmatpush1.bf16.msra.mxu0 %v4775_v14  ;;  %407 = vmatprep.subr.bf16.mxu1 %v4803_v25  ;;  %v4821_v47 = vld [vmem:[%s6861_s1 + $0x68] ss:$16 sps:$4 sm:$0xff]   ;;  %v4826_v48 = vld [vmem:[%s6861_s1 + $0x10c] ss:$16 sps:$4 sm:$0xff]   ;;  %v4806_v49 = vld [vmem:[%s6861_s1 + $0x140] ss:$16 sps:$4 sm:$0xff]  }
  0x15   : > { %527 = vmatprep.subr.bf16.mxu0 %v4778_v15  ;;  %v4814_v50 = vld [vmem:[%s6861_s1 + $0x164] ss:$16 sps:$4 sm:$0xff]   ;;  %v4824_v51 = vld [vmem:[%s6861_s1 + $0x108] ss:$16 sps:$4 sm:$0xff]   ;;  %v4829_v52 = vld [vmem:[%s6861_s1 + $0x12c] ss:$16 sps:$4 sm:$0xff]  }
  0x16   : > { %v4812_v53 = vld [vmem:[%s6861_s1 + $0x160] ss:$16 sps:$4 sm:$0xff]   ;;  %v4827_v56 = vld [vmem:[%s6861_s1 + $0x128] ss:$16 sps:$4 sm:$0xff]   ;;  %v4838_v57 = vld [vmem:[%s6863_s3 + $0x404] ss:$16 sps:$4 sm:$0xff]  }
  0x17   : > { %408 = vmatpush1.bf16.msra.mxu1 %v4805_v28  ;;  %v4832_v58 = vld [vmem:[%s6861_s1 + $0x14c] ss:$16 sps:$4 sm:$0xff]   ;;  %v4830_v60 = vld [vmem:[%s6861_s1 + $0x148] ss:$16 sps:$4 sm:$0xff]   ;;  %v4836_v61 = vld [vmem:[%s6863_s3 + $0x400] ss:$16 sps:$4 sm:$0xff]  }
  0x18   : > { %570 = vmatprep.subr.bf16.mxu1 %v4811_v29  ;;  %v4844_v62 = vld [vmem:[%s6863_s3 + $0x424] ss:$16 sps:$4 sm:$0xff]   ;;  %v4835_v63 = vld [vmem:[%s6861_s1 + $0x16c] ss:$16 sps:$4 sm:$0xff]   ;;  %v4833_v0 = vld [vmem:[%s6861_s1 + $0x168] ss:$16 sps:$4 sm:$0xff]  }
  0x19   : > { %v4842_v1 = vld [vmem:[%s6863_s3 + $0x420] ss:$16 sps:$4 sm:$0xff]   ;;  %v4841_v3 = vld [vmem:[%s6863_s3 + $0x40c] ss:$16 sps:$4 sm:$0xff]   ;;  %v4839_v4 = vld [vmem:[%s6863_s3 + $0x408] ss:$16 sps:$4 sm:$0xff]  }
  0x1a   : > { %v255_v20 = vld [vmem:[#allocation2 + $0x1] sm:$0xff]  ;;  %v256_v21 = vld [vmem:[#allocation2 + $0x9] sm:$0xff]  ;;  %vm1187_vm4 = vsmask.f32 7424 }
  0x1b   : > { %v257_v22 = vpack.c.bf16 %v256_v21, %v255_v20  ;;  %v236_v36 = vld [vmem:[#allocation2] sm:$0xff]  ;;  %v237_v37 = vld [vmem:[#allocation2 + $0x8] sm:$0xff] }
  0x1c   : > { %v238_v40 = vpack.c.bf16 %v237_v37, %v236_v36  ;;  %v613_v54 = vld [vmem:[#allocation2 + $0x2] sm:$0xff]  ;;  %v614_v55 = vld [vmem:[#allocation2 + $0xa] sm:$0xff] }
  0x1d   : > { %3996 = vmatmul.mubr.msk.bf16.vlgmr.msra.gmra.mrb[0].mxu0 %vm233_vm1, %v257_v22  ;;  %3997 = vmatmul.mubr.msk.bf16.vlgmr.msra.gmra.mrb[0].mxu1 %vm233_vm1, %v257_v22  ;;  %v615_v59 = vpack.c.bf16 %v614_v55, %v613_v54  ;;  %v4847_v5 = vld [vmem:[%s6863_s3 + $0x42c] ss:$16 sps:$4 sm:$0xff]   ;;  %v4848_v7 = vld [vmem:[%s6863_s3 + $0x440] ss:$16 sps:$4 sm:$0xff]   ;;  %v4856_v8 = vld [vmem:[%s6863_s3 + $0x464] ss:$16 sps:$4 sm:$0xff]  }
  0x1e   : > { %528 = vmatpush1.bf16.msra.mxu0 %v4776_v19  ;;  %559 = vmatprep.mubr.bf16.mxu0 %v5421_v2  ;;  %v4854_v9 = vld [vmem:[%s6863_s3 + $0x460] ss:$16 sps:$4 sm:$0xff]   ;;  %v4845_v10 = vld [vmem:[%s6863_s3 + $0x428] ss:$16 sps:$4 sm:$0xff]   ;;  %v4862_v11 = vld [vmem:[%s6863_s3 + $0x484] ss:$16 sps:$4 sm:$0xff]  }
  0x1f   : > { %529 = vmatprep.subr.bf16.mxu0 %v4781_v23  ;;  %571 = vmatpush1.bf16.msra.mxu1 %v4809_v32  ;;  %v4853_v12 = vld [vmem:[%s6863_s3 + $0x44c] ss:$16 sps:$4 sm:$0xff]   ;;  %v4860_v13 = vld [vmem:[%s6863_s3 + $0x480] ss:$16 sps:$4 sm:$0xff]   ;;  %v4851_v14 = vld [vmem:[%s6863_s3 + $0x448] ss:$16 sps:$4 sm:$0xff]  }
  0x20   : > { %572 = vmatprep.subr.bf16.mxu1 %v4817_v33  ;;  %602 = vmatprep.mubr.bf16.mxu1 %v5421_v2  ;;  %v4868_v15 = vld [vmem:[%s6863_s3 + $0x4a4] ss:$16 sps:$4 sm:$0xff]   ;;  %v4859_v16 = vld [vmem:[%s6863_s3 + $0x46c] ss:$16 sps:$4 sm:$0xff]   ;;  %v4866_v17 = vld [vmem:[%s6863_s3 + $0x4a0] ss:$16 sps:$4 sm:$0xff]  }
  0x21   : > { %v4857_v18 = vld [vmem:[%s6863_s3 + $0x468] ss:$16 sps:$4 sm:$0xff]   ;;  %v4874_v19 = vld [vmem:[%s6863_s3 + $0x4c4] ss:$16 sps:$4 sm:$0xff]   ;;  %v4865_v20 = vld [vmem:[%s6863_s3 + $0x48c] ss:$16 sps:$4 sm:$0xff]  }
  0x22   : > { %530 = vmatpush1.bf16.msra.mxu0 %v4779_v26  ;;  %v4872_v21 = vld [vmem:[%s6863_s3 + $0x4c0] ss:$16 sps:$4 sm:$0xff]   ;;  %v4863_v22 = vld [vmem:[%s6863_s3 + $0x488] ss:$16 sps:$4 sm:$0xff]   ;;  %v4880_v23 = vld [vmem:[%s6863_s3 + $0x4e4] ss:$16 sps:$4 sm:$0xff]  }
  0x23   : > { %531 = vmatprep.subr.bf16.mxu0 %v4784_v27  ;;  %573 = vmatpush1.bf16.msra.mxu1 %v4815_v38  ;;  %v4871_v24 = vld [vmem:[%s6863_s3 + $0x4ac] ss:$16 sps:$4 sm:$0xff]   ;;  %v4878_v25 = vld [vmem:[%s6863_s3 + $0x4e0] ss:$16 sps:$4 sm:$0xff]   ;;  %v4869_v26 = vld [vmem:[%s6863_s3 + $0x4a8] ss:$16 sps:$4 sm:$0xff]  }
  0x24   : > { %574 = vmatprep.subr.bf16.mxu1 %v4820_v39  ;;  %v4886_v27 = vld [vmem:[%s6863_s3 + $0x504] ss:$16 sps:$4 sm:$0xff]   ;;  %v4877_v28 = vld [vmem:[%s6863_s3 + $0x4cc] ss:$16 sps:$4 sm:$0xff]   ;;  %v4884_v29 = vld [vmem:[%s6863_s3 + $0x500] ss:$16 sps:$4 sm:$0xff]  }
  0x25   : > { %v4881_v32 = vld [vmem:[%s6863_s3 + $0x4e8] ss:$16 sps:$4 sm:$0xff]   ;;  %v4889_v33 = vld [vmem:[%s6863_s3 + $0x50c] ss:$16 sps:$4 sm:$0xff]   ;;  %v4890_v37 = vld [vmem:[%s6863_s3 + $0x520] ss:$16 sps:$4 sm:$0xff]  }
  0x26   : > { %532 = vmatpush1.bf16.msra.mxu0 %v4782_v30  ;;  %v4875_v30 = vld [vmem:[%s6863_s3 + $0x4c8] ss:$16 sps:$4 sm:$0xff]   ;;  %v4895_v36 = vld [vmem:[%s6863_s3 + $0x52c] ss:$16 sps:$4 sm:$0xff]   ;;  %v4898_v39 = vld [vmem:[%s6863_s3 + $0x544] ss:$16 sps:$4 sm:$0xff]  }
  0x27   : > { %533 = vmatprep.subr.bf16.mxu0 %v4790_v31  ;;  %575 = vmatpush1.bf16.msra.mxu1 %v4818_v43  ;;  %v4883_v31 = vld [vmem:[%s6863_s3 + $0x4ec] ss:$16 sps:$4 sm:$0xff]   ;;  %v4893_v38 = vld [vmem:[%s6863_s3 + $0x528] ss:$16 sps:$4 sm:$0xff]   ;;  %v812_v43 = vlaneseq  ;;  %v4922_v55 = vld [vmem:[%s6863_s3 + $0x5c4] ss:$16 sps:$4 sm:$0xff]  }
  0x28   : > { %576 = vmatprep.subr.bf16.mxu1 %v4823_v44  ;;  %v4904_v44 = vld [vmem:[%s6863_s3 + $0x564] ss:$16 sps:$4 sm:$0xff]   ;;  %v4919_v54 = vld [vmem:[%s6863_s3 + $0x5ac] ss:$16 sps:$4 sm:$0xff]  }
  0x29   : > { %vm850_vm2 = vcmp.lt.s32.totalorder %v812_v43, 512 }
  0x2a   : > { %534 = vmatpush1.bf16.msra.mxu0 %v4788_v34  ;;  %v4887_v34 = vld [vmem:[%s6863_s3 + $0x508] ss:$16 sps:$4 sm:$0xff]   ;;  %852 = vst.msk [vmem:[#allocation3] ss:$8 sm:$0xf] %vm850_vm2, %v5422_v6 }
  0x2b   : > { %716 = vmatprep.subr.bf16.mxu0 %v4796_v35  ;;  %577 = vmatpush1.bf16.msra.mxu1 %v4821_v47  ;;  %v4892_v35 = vld [vmem:[%s6863_s3 + $0x524] ss:$16 sps:$4 sm:$0xff]   ;;  %855 = vst.msk [vmem:[#allocation3 + $0x41] ss:$8 sm:$0xf] %vm850_vm2, %v5422_v6 }
  0x2c   : > { %759 = vmatprep.subr.bf16.mxu1 %v4826_v48  ;;  %v4905_v47 = vld [vmem:[%s6863_s3 + $0x568] ss:$16 sps:$4 sm:$0xff]   ;;  %v4910_v48 = vld [vmem:[%s6863_s3 + $0x584] ss:$16 sps:$4 sm:$0xff]   ;;  %v4913_v6 = vld [vmem:[%s6863_s3 + $0x58c] ss:$16 sps:$4 sm:$0xff]  }
  0x2d   : > { %4014 = vmatmul.mubr.msk.bf16.vlgmr.msra.gmra.mrb[0].mxu0 %vm233_vm1, %v238_v40 }
  0x2e   : > { %717 = vmatpush1.bf16.msra.mxu0 %v4794_v41  ;;  %748 = vmatprep.mubr.bf16.mxu0 %v5421_v2  ;;  %v4896_v41 = vld [vmem:[%s6863_s3 + $0x540] ss:$16 sps:$4 sm:$0xff]  }
  0x2f   : > { %718 = vmatprep.subr.bf16.mxu0 %v4802_v42  ;;  %4015 = vmatmul.mubr.msk.bf16.vlgmr.msra.gmra.mrb[0].mxu1 %vm233_vm1, %v238_v40  ;;  %v4901_v40 = vld [vmem:[%s6863_s3 + $0x54c] ss:$16 sps:$4 sm:$0xff]   ;;  %v4899_v42 = vld [vmem:[%s6863_s3 + $0x548] ss:$16 sps:$4 sm:$0xff]  }
  0x30   : > { %760 = vmatpush1.bf16.msra.mxu1 %v4824_v51  ;;  %791 = vmatprep.mubr.bf16.mxu1 %v5421_v2  ;;  %v4850_v2 = vld [vmem:[%s6863_s3 + $0x444] ss:$16 sps:$4 sm:$0xff]   ;;  %v4914_v51 = vld [vmem:[%s6863_s3 + $0x5a0] ss:$16 sps:$4 sm:$0xff]  }
  0x31   : > { %761 = vmatprep.subr.bf16.mxu1 %v4829_v52  ;;  %v4916_v52 = vld [vmem:[%s6863_s3 + $0x5a4] ss:$16 sps:$4 sm:$0xff]  }
  0x32   : > { %719 = vmatpush1.bf16.msra.mxu0 %v4800_v45  ;;  %v4907_v45 = vld [vmem:[%s6863_s3 + $0x56c] ss:$16 sps:$4 sm:$0xff]  }
  0x33   : > { %720 = vmatprep.subr.bf16.mxu0 %v4808_v46  ;;  %v4902_v46 = vld [vmem:[%s6863_s3 + $0x560] ss:$16 sps:$4 sm:$0xff]  }
  0x34   : > { %762 = vmatpush1.bf16.msra.mxu1 %v4827_v56  ;;  %v4920_v56 = vld [vmem:[%s6863_s3 + $0x5c0] ss:$16 sps:$4 sm:$0xff]  }
  0x35   : > { %763 = vmatprep.subr.bf16.mxu1 %v4832_v58  ;;  %v4923_v58 = vld [vmem:[%s6863_s3 + $0x5c8] ss:$16 sps:$4 sm:$0xff]  }
  0x36   : > { %721 = vmatpush1.bf16.msra.mxu0 %v4806_v49  ;;  %v4908_v49 = vld [vmem:[%s6863_s3 + $0x580] ss:$16 sps:$4 sm:$0xff]  }
  0x37   : > { %722 = vmatprep.subr.bf16.mxu0 %v4814_v50  ;;  %v4911_v50 = vld [vmem:[%s6863_s3 + $0x588] ss:$16 sps:$4 sm:$0xff]  }
  0x38   : > { %764 = vmatpush1.bf16.msra.mxu1 %v4830_v60  ;;  %v4931_v60 = vld [vmem:[%s6863_s3 + $0x5ec] ss:$16 sps:$4 sm:$0xff]  }
  0x39   : > { %765 = vmatprep.subr.bf16.mxu1 %v4835_v63  ;;  %v4934_v63 = vld [vmem:[%s6863_s3 + $0x604] ss:$16 sps:$4 sm:$0xff]  }
  0x3a   : > { %723 = vmatpush1.bf16.msra.mxu0 %v4812_v53  ;;  %v4917_v53 = vld [vmem:[%s6863_s3 + $0x5a8] ss:$16 sps:$4 sm:$0xff]  }
  0x3b   : > { %1880 = vmatprep.subr.bf16.mxu0 %v4838_v57  ;;  %v4925_v57 = vld [vmem:[%s6863_s3 + $0x5cc] ss:$16 sps:$4 sm:$0xff]  }
  0x3c   : > { %766 = vmatpush1.bf16.msra.mxu1 %v4833_v0  ;;  %v4937_v0 = vld [vmem:[%s6863_s3 + $0x60c] ss:$16 sps:$4 sm:$0xff]  }
  0x3d   : > { %4048 = vmatmul.mubr.msk.bf16.vlgmr.msra.gmra.mrb[0].mxu0 %vm233_vm1, %v615_v59  ;;  %1966 = vmatprep.subr.bf16.mxu1 %v4841_v3  ;;  %v810_v3 = vld [vmem:[%s6862_s2] sm:$0xf] }
  0x3e   : > { %1881 = vmatpush1.bf16.msra.mxu0 %v4836_v61  ;;  %v4926_v61 = vld [vmem:[%s6863_s3 + $0x5e0] ss:$16 sps:$4 sm:$0xff]  }
  0x3f   : > { %1882 = vmatprep.subr.bf16.mxu0 %v4844_v62  ;;  %4049 = vmatmul.mubr.msk.bf16.vlgmr.msra.gmra.mrb[0].mxu1 %vm233_vm1, %v615_v59  ;;  %v4928_v59 = vld [vmem:[%s6863_s3 + $0x5e4] ss:$16 sps:$4 sm:$0xff]   ;;  %v4929_v62 = vld [vmem:[%s6863_s3 + $0x5e8] ss:$16 sps:$4 sm:$0xff]  }
  0x40   : > { %1967 = vmatpush1.bf16.msra.mxu1 %v4839_v4 }
  0x41   : > { %1968 = vmatprep.subr.bf16.mxu1 %v4847_v5 }
  0x42   : > { %1883 = vmatpush1.bf16.msra.mxu0 %v4842_v1  ;;  %v5827_v1 = vshrl.u32 %v812_v43, 7 }
  0x43   : > { %1884 = vmatprep.subr.bf16.mxu0 %v4850_v2 }
  0x44   : > { %1969 = vmatpush1.bf16.msra.mxu1 %v4845_v10  ;;  %v814_v2 = vsub.s32 0, %v5827_v1  ;;  %v818_v4 = vsub.s32 1, %v5827_v1 }
  0x45   : > { %1970 = vmatprep.subr.bf16.mxu1 %v4853_v12 }
  0x46   : > { %1885 = vmatpush1.bf16.msra.mxu0 %v4848_v7  ;;  %v815_v5 = vrot.slane %v810_v3, %v814_v2  ;;  %v819_v7 = vrot.slane %v810_v3, %v818_v4 }
  0x47   : > { %1886 = vmatprep.subr.bf16.mxu0 %v4856_v8 }
  0x48   : > { %1971 = vmatpush1.bf16.msra.mxu1 %v4851_v14 }
  0x49   : > { %1972 = vmatprep.subr.bf16.mxu1 %v4859_v16 }
  0x4a   : > { %1887 = vmatpush1.bf16.msra.mxu0 %v4854_v9 }
  0x4b   : > { %1888 = vmatprep.subr.bf16.mxu0 %v4862_v11 }
  0x4c   : > { %1973 = vmatpush1.bf16.msra.mxu1 %v4857_v18 }
  0x4d   : > { %1974 = vmatprep.subr.bf16.mxu1 %v4865_v20 }
  0x4e   : > { %1889 = vmatpush1.bf16.msra.mxu0 %v4860_v13  ;;  %v822_v13 = vsub.s32 2, %v5827_v1 }
  0x4f   : > { %1890 = vmatprep.subr.bf16.mxu0 %v4868_v15 }
  0x50   : > { %1975 = vmatpush1.bf16.msra.mxu1 %v4863_v22 }
  0x51   : > { %1976 = vmatprep.subr.bf16.mxu1 %v4871_v24  ;;  %v823_v24 = vrot.slane %v810_v3, %v822_v13 }
  0x52   : > { %1891 = vmatpush1.bf16.msra.mxu0 %v4866_v17  ;;  %v826_v17 = vsub.s32 3, %v5827_v1 }
  0x53   : > { %1892 = vmatprep.subr.bf16.mxu0 %v4874_v19 }
  0x54   : > { %1977 = vmatpush1.bf16.msra.mxu1 %v4869_v26  ;;  %v827_v26 = vrot.slane %v810_v3, %v826_v17 }
  0x55   : > { %1978 = vmatprep.subr.bf16.mxu1 %v4877_v28 }
  0x56   : > { %1893 = vmatpush1.bf16.msra.mxu0 %v4872_v21 }
  0x57   : > { %1894 = vmatprep.subr.bf16.mxu0 %v4880_v23 }
  0x58   : > { %1979 = vmatpush1.bf16.msra.mxu1 %v4875_v30 }
  0x59   : > { %1980 = vmatprep.subr.bf16.mxu1 %v4883_v31 }
  0x5a   : > { %1895 = vmatpush1.bf16.msra.mxu0 %v4878_v25 }
  0x5b   : > { %1896 = vmatprep.subr.bf16.mxu0 %v4886_v27 }
  0x5c   : > { %1981 = vmatpush1.bf16.msra.mxu1 %v4881_v32 }
  0x5d   : > { %1982 = vmatprep.subr.bf16.mxu1 %v4889_v33 }
  0x5e   : > { %1897 = vmatpush1.bf16.msra.mxu0 %v4884_v29 }
  0x5f   : > { %1898 = vmatprep.subr.bf16.mxu0 %v4892_v35 }
  0x60   : > { %1983 = vmatpush1.bf16.msra.mxu1 %v4887_v34 }
  0x61   : > { %1984 = vmatprep.subr.bf16.mxu1 %v4895_v36 }
  0x62   : > { %1899 = vmatpush1.bf16.msra.mxu0 %v4890_v37 }
  0x63   : > { %1900 = vmatprep.subr.bf16.mxu0 %v4898_v39 }
  0x64   : > { %1985 = vmatpush1.bf16.msra.mxu1 %v4893_v38 }
  0x65   : > { %1986 = vmatprep.subr.bf16.mxu1 %v4901_v40 }
  0x66   : > { %1901 = vmatpush1.bf16.msra.mxu0 %v4896_v41 }
  0x67   : > { %1902 = vmatprep.subr.bf16.mxu0 %v4904_v44 }
  0x68   : > { %1987 = vmatpush1.bf16.msra.mxu1 %v4899_v42 }
  0x69   : > { %1988 = vmatprep.subr.bf16.mxu1 %v4907_v45 }
  0x6a   : > { %1903 = vmatpush1.bf16.msra.mxu0 %v4902_v46 }
  0x6b   : > { %1904 = vmatprep.subr.bf16.mxu0 %v4910_v48 }
  0x6c   : > { %1989 = vmatpush1.bf16.msra.mxu1 %v4905_v47 }
  0x6d   : > { %1990 = vmatprep.subr.bf16.mxu1 %v4913_v6 }
  0x6e   : > { %1905 = vmatpush1.bf16.msra.mxu0 %v4908_v49 }
  0x6f   : > { %1906 = vmatprep.subr.bf16.mxu0 %v4916_v52 }
  0x70   : > { %1991 = vmatpush1.bf16.msra.mxu1 %v4911_v50 }
  0x71   : > { %1992 = vmatprep.subr.bf16.mxu1 %v4919_v54 }
  0x72   : > { %1907 = vmatpush1.bf16.msra.mxu0 %v4914_v51 }
  0x73   : > { %1908 = vmatprep.subr.bf16.mxu0 %v4922_v55 }
  0x74   : > { %1993 = vmatpush1.bf16.msra.mxu1 %v4917_v53 }
  0x75   : > { %1994 = vmatprep.subr.bf16.mxu1 %v4925_v57 }
  0x76   : > { %1909 = vmatpush1.bf16.msra.mxu0 %v4920_v56 }
  0x77   : > { %1910 = vmatprep.subr.bf16.mxu0 %v4928_v59 }
  0x78   : > { %1995 = vmatpush1.bf16.msra.mxu1 %v4923_v58 }
  0x79   : > { %1996 = vmatprep.subr.bf16.mxu1 %v4931_v60 }
  0x7a   : > { %1911 = vmatpush1.bf16.msra.mxu0 %v4926_v61 }
  0x7b   : > { %1923 = vmatprep.subr.bf16.mxu0 %v4934_v63 }
  0x7c   : > { %1997 = vmatpush1.bf16.msra.mxu1 %v4929_v62 }
  0x7d   : > { %2009 = vmatprep.subr.bf16.mxu1 %v4937_v0 }
 0x110   : > { %v750_v8 = vpop.f32.mrb[0].mxu0 }
 0x111   : > { %v832_v9 = vadd.f32 %v815_v5, %v750_v8  ;;  %v752_v10 = vpop.f32.mrb[1].mxu0  ;;  %v4935_v8 = vld [vmem:[%s6863_s3 + $0x608] ss:$16 sps:$4 sm:$0xff]  }
 0x112   : > { %v833_v11 = vadd.f32 %v819_v7, %v752_v10  ;;  %v754_v12 = vpop.f32.mrb[2].mxu0  ;;  %v793_v29 = vpop.f32.mrb[0].mxu1 }
 0x113   : > { %v840_v14 = vmax.f32 %v832_v9, 0.0  ;;  %v836_v15 = vadd.f32 %v815_v5, %v754_v12  ;;  %v756_v16 = vpop.f32.mrb[3].mxu0  ;;  %v834_v31 = vadd.f32 %v823_v24, %v793_v29  ;;  %v795_v32 = vpop.f32.mrb[1].mxu1  ;;  %v4940_v9 = vld [vmem:[%s6863_s3 + $0x624] ss:$16 sps:$4 sm:$0xff]  }
 0x114   : > { %v841_v18 = vmax.f32 %v833_v11, 0.0  ;;  %v837_v19 = vadd.f32 %v819_v7, %v756_v16  ;;  %v835_v33 = vadd.f32 %v827_v26, %v795_v32  ;;  %v797_v34 = vpop.f32.mrb[2].mxu1  ;;  %v4932_v7 = vld [vmem:[%s6863_s3 + $0x600] ss:$16 sps:$4 sm:$0xff]   ;;  %v4943_v12 = vld [vmem:[%s6863_s3 + $0x62c] ss:$16 sps:$4 sm:$0xff]  }
 0x115   : > { %v866_v20 = vrot.slane %v840_v14, 7  ;;  %v844_v21 = vmax.f32 %v836_v15, 0.0  ;;  %v842_v35 = vmax.f32 %v834_v31, 0.0  ;;  %v838_v36 = vadd.f32 %v823_v24, %v797_v34  ;;  %v799_v37 = vpop.f32.mrb[3].mxu1  ;;  %v4946_v29 = vld [vmem:[%s6863_s3 + $0x644] ss:$16 sps:$4 sm:$0xff]  }
 0x116   : > { %v867_v22 = vrot.slane %v841_v18, 7  ;;  %v845_v23 = vmax.f32 %v837_v19, 0.0  ;;  %v843_v38 = vmax.f32 %v835_v33, 0.0  ;;  %v839_v39 = vadd.f32 %v827_v26, %v799_v37  ;;  %v4949_v34 = vld [vmem:[%s6863_s3 + $0x64c] ss:$16 sps:$4 sm:$0xff]  }
 0x117   : > { %890 = vst [vmem:[#allocation3] sm:$0xfe] %v866_v20  ;;  %v870_v25 = vrot.slane %v844_v21, 7  ;;  %v868_v40 = vrot.slane %v842_v35, 7  ;;  %v846_v41 = vmax.f32 %v838_v36, 0.0 }
 0x118   : > { %891 = vst [vmem:[#allocation3 + $0x8] sm:$0xfe] %v867_v22  ;;  %v872_v27 = vrot.slane %v845_v23, 7  ;;  %v869_v43 = vrot.slane %v843_v38, 7  ;;  %v847_v46 = vmax.f32 %v839_v39, 0.0 }
 0x119   : > { %v5845_v28 = vsel %vm865_vm3, %v866_v20, %v870_v25  ;;  %898 = vst [vmem:[#allocation3 + $0x40] sm:$0x1] %v870_v25  ;;  %892 = vst [vmem:[#allocation3 + $0x10] sm:$0xfe] %v868_v40  ;;  %v874_v48 = vrot.slane %v846_v41, 7 }
 0x11a   : > { %894 = vst [vmem:[#allocation3 + $0x20] sm:$0xff] %v5845_v28  ;;  %v5849_v30 = vsel %vm865_vm3, %v867_v22, %v872_v27  ;;  %899 = vst [vmem:[#allocation3 + $0x48] sm:$0x1] %v872_v27  ;;  %v876_v52 = vrot.slane %v847_v46, 7  ;;  %v4938_v21 = vld [vmem:[%s6863_s3 + $0x620] ss:$16 sps:$4 sm:$0xff]  }
 0x11b   : > { %893 = vst [vmem:[#allocation3 + $0x18] sm:$0xfe] %v869_v43  ;;  %v5854_v55 = vsel %vm865_vm3, %v868_v40, %v874_v48  ;;  %900 = vst [vmem:[#allocation3 + $0x50] sm:$0x1] %v874_v48  ;;  %v4941_v27 = vld [vmem:[%s6863_s3 + $0x628] ss:$16 sps:$4 sm:$0xff]  }
 0x11c   : > { %v5857_v59 = vsel %vm865_vm3, %v869_v43, %v876_v52  ;;  %901 = vst [vmem:[#allocation3 + $0x58] sm:$0x1] %v876_v52  ;;  %v4944_v41 = vld [vmem:[%s6863_s3 + $0x640] ss:$16 sps:$4 sm:$0xff]  }
 0x11e   : > { %v1042_v42 = vld [vmem:[#allocation3] sm:$0xfe] }
 0x11f   : > { %v1043_v44 = vld [vmem:[#allocation3 + $0x8] sm:$0xfe]  ;;  %v1050_v45 = vpack.c.bf16 %v5845_v28, %v1042_v42  ;;  %v4947_v42 = vld [vmem:[%s6863_s3 + $0x648] ss:$16 sps:$4 sm:$0xff]  }
 0x120   : > { %v1051_v47 = vpack.c.bf16 %v5849_v30, %v1043_v44  ;;  %v1046_v6 = vld [vmem:[#allocation3 + $0x40] sm:$0x1]  ;;  %v1044_v10 = vld [vmem:[#allocation3 + $0x10] sm:$0xfe] }
 0x121   : > { %v1047_v49 = vld [vmem:[#allocation3 + $0x48] sm:$0x1]  ;;  %v1054_v50 = vpack.c.bf16 %v1046_v6, %v1046_v6  ;;  %v1191_v51 = vshll.u32 %v1050_v45, 16  ;;  %v1189_v56 = vshrl.u32 %v1050_v45, 16  ;;  %v1052_v15 = vpack.c.bf16 %v5854_v55, %v1044_v10  ;;  %v2866_v6 = vld [vmem:[#allocation3 + $0x10] sm:$0xfc] }
 0x122   : > { %v1055_v53 = vpack.c.bf16 %v1047_v49, %v1047_v49  ;;  %v1203_v54 = vshll.u32 %v1051_v47, 16  ;;  %v1201_v60 = vshrl.u32 %v1051_v47, 16  ;;  %v1045_v14 = vld [vmem:[#allocation3 + $0x18] sm:$0xfe]  ;;  %v1048_v20 = vld [vmem:[#allocation3 + $0x50] sm:$0x1] }
 0x123   : > { %v1193_v57 = vrot.slane %v1191_v51, 1  ;;  %v1196_v58 = vshll.u32 %v1054_v50, 16  ;;  %v2867_v16 = vld [vmem:[#allocation3 + $0x18] sm:$0xfc]  ;;  %v1053_v19 = vpack.c.bf16 %v5857_v59, %v1045_v14  ;;  %v1049_v22 = vld [vmem:[#allocation3 + $0x58] sm:$0x1]  ;;  %v1056_v23 = vpack.c.bf16 %v1048_v20, %v1048_v20 }
 0x124   : > { %v1205_v61 = vrot.slane %v1203_v54, 1  ;;  %v1208_v62 = vshll.u32 %v1055_v53, 16  ;;  %v1213_v24 = vshrl.u32 %v1052_v15, 16  ;;  %v1215_v25 = vshll.u32 %v1052_v15, 16  ;;  %v2871_v37 = vld [vmem:[#allocation3 + $0x58] sm:$0x3] }
 0x125   : > { %v1194_v63 = vor.u32 %v1193_v57, %v1189_v56  ;;  %v1198_v0 = vrot.slane %v1196_v58, 1  ;;  %v2875_v26 = vpack.c.bf16 %v5857_v59, %v2867_v16  ;;  %v1057_v31 = vpack.c.bf16 %v1049_v22, %v1049_v22  ;;  %v2870_v49 = vld [vmem:[#allocation3 + $0x50] sm:$0x3]  ;;  %v4952_v50 = vld [vmem:[%s6863_s3 + $0x664] ss:$16 sps:$4 sm:$0xff]  }
 0x126   : > { %v1206_v3 = vor.u32 %v1205_v61, %v1201_v60  ;;  %v1210_v5 = vrot.slane %v1208_v62, 1  ;;  %v1225_v32 = vshrl.u32 %v1053_v19, 16  ;;  %v1227_v33 = vshll.u32 %v1053_v19, 16  ;;  %v4955_v51 = vld [vmem:[%s6863_s3 + $0x66c] ss:$16 sps:$4 sm:$0xff]  }
 0x127   : > { %v1199_v18 = vsel %vm1187_vm4, %v1194_v63, %v1198_v0  ;;  %v1217_v35 = vrot.slane %v1215_v25, 1  ;;  %v1220_v36 = vshll.u32 %v1056_v23, 16  ;;  %v1232_v39 = vshll.u32 %v1057_v31, 16  ;;  %v4950_v61 = vld [vmem:[%s6863_s3 + $0x660] ss:$16 sps:$4 sm:$0xff]  }
 0x128   : > { %v1211_v11 = vsel %vm1187_vm4, %v1206_v3, %v1210_v5  ;;  %v1229_v38 = vrot.slane %v1227_v33, 1  ;;  %v2879_v40 = vpack.c.bf16 %v2871_v37, %v2871_v37  ;;  %v3027_v45 = vrot.slane %v2875_v26, 1  ;;  %v4953_v62 = vld [vmem:[%s6863_s3 + $0x668] ss:$16 sps:$4 sm:$0xff]   ;;  %v4958_v63 = vld [vmem:[%s6863_s3 + $0x684] ss:$16 sps:$4 sm:$0xff]  }
 0x129   : > { %1912 = vmatprep.mubr.bf16.mxu0 %v1211_v11  ;;  %1998 = vmatprep.mubr.bf16.mxu1 %v1211_v11  ;;  %v1218_v43 = vor.u32 %v1217_v35, %v1213_v24  ;;  %v1222_v44 = vrot.slane %v1220_v36, 1  ;;  %v1234_v47 = vrot.slane %v1232_v39, 1  ;;  %v2874_v53 = vpack.c.bf16 %v5854_v55, %v2866_v6  ;;  %v4961_v0 = vld [vmem:[%s6863_s3 + $0x68c] ss:$16 sps:$4 sm:$0xff]   ;;  %v4956_v5 = vld [vmem:[%s6863_s3 + $0x680] ss:$16 sps:$4 sm:$0xff]  }
 0x12a   : > { %1913 = vmatmul.mubr.bf16.vlgmr.msra.gmra.mrb[4].mxu0 %v1199_v18  ;;  %1999 = vmatmul.mubr.bf16.vlgmr.msra.gmra.mrb[4].mxu1 %v1199_v18  ;;  %v1230_v46 = vor.u32 %v1229_v38, %v1225_v32  ;;  %v3028_v48 = vrot.slane %v2879_v40, 1  ;;  %v2878_v54 = vpack.c.bf16 %v2870_v49, %v2870_v49  ;;  %v4962_v10 = vld [vmem:[%s6863_s3 + $0x6a0] ss:$16 sps:$4 sm:$0xff]   ;;  %v4965_v11 = vld [vmem:[%s6863_s3 + $0x6a8] ss:$16 sps:$4 sm:$0xff]  }
 0x12b   : > { %1924 = vmatpush1.bf16.msra.mxu0 %v4932_v7  ;;  %2010 = vmatpush1.bf16.msra.mxu1 %v4935_v8  ;;  %v5901_v52 = vsel %vm1187_vm4, %v1218_v43, %v1222_v44  ;;  %v3024_v58 = vrot.slane %v2874_v53, 1  ;;  %v4959_v7 = vld [vmem:[%s6863_s3 + $0x688] ss:$16 sps:$4 sm:$0xff]   ;;  %v4964_v8 = vld [vmem:[%s6863_s3 + $0x6a4] ss:$16 sps:$4 sm:$0xff]  }
 0x12c   : > { %1925 = vmatprep.subr.bf16.mxu0 %v4940_v9  ;;  %2011 = vmatprep.subr.bf16.mxu1 %v4943_v12  ;;  %v1235_v56 = vsel %vm1187_vm4, %v1230_v46, %v1234_v47  ;;  %v5906_v57 = vsel %vm3017_vm5, %v3027_v45, %v3028_v48  ;;  %v3025_v60 = vrot.slane %v2878_v54, 1  ;;  %v4967_v9 = vld [vmem:[%s6863_s3 + $0x6ac] ss:$16 sps:$4 sm:$0xff]   ;;  %v4970_v12 = vld [vmem:[%s6863_s3 + $0x6c4] ss:$16 sps:$4 sm:$0xff]  }
 0x12d   : > { %1955 = vmatprep.mubr.bf16.mxu0 %v1235_v56  ;;  %2041 = vmatprep.mubr.bf16.mxu1 %v1235_v56  ;;  %v4973_v14 = vld [vmem:[%s6863_s3 + $0x6cc] ss:$16 sps:$4 sm:$0xff]   ;;  %v4968_v15 = vld [vmem:[%s6863_s3 + $0x6c0] ss:$16 sps:$4 sm:$0xff]   ;;  %v4971_v16 = vld [vmem:[%s6863_s3 + $0x6c8] ss:$16 sps:$4 sm:$0xff]  }
 0x12e   : > { %v5921_v3 = vsel %vm3017_vm5, %v3024_v58, %v3025_v60  ;;  %v4976_v18 = vld [vmem:[%s6863_s3 + $0x6e4] ss:$16 sps:$4 sm:$0xff]   ;;  %v4979_v19 = vld [vmem:[%s6863_s3 + $0x6ec] ss:$16 sps:$4 sm:$0xff]   ;;  %v4974_v20 = vld [vmem:[%s6863_s3 + $0x6e0] ss:$16 sps:$4 sm:$0xff]  }
 0x12f   : > { %1926 = vmatpush1.bf16.msra.mxu0 %v4938_v21  ;;  %2012 = vmatpush1.bf16.msra.mxu1 %v4941_v27  ;;  %v4977_v21 = vld [vmem:[%s6863_s3 + $0x6e8] ss:$16 sps:$4 sm:$0xff]   ;;  %v4982_v22 = vld [vmem:[%s6863_s3 + $0x704] ss:$16 sps:$4 sm:$0xff]   ;;  %v4985_v23 = vld [vmem:[%s6863_s3 + $0x70c] ss:$16 sps:$4 sm:$0xff]  }
 0x130   : > { %1927 = vmatprep.subr.bf16.mxu0 %v4946_v29  ;;  %2013 = vmatprep.subr.bf16.mxu1 %v4949_v34  ;;  %v4980_v24 = vld [vmem:[%s6863_s3 + $0x700] ss:$16 sps:$4 sm:$0xff]   ;;  %v4983_v25 = vld [vmem:[%s6863_s3 + $0x708] ss:$16 sps:$4 sm:$0xff]   ;;  %v4988_v26 = vld [vmem:[%s6863_s3 + $0x724] ss:$16 sps:$4 sm:$0xff]  }
 0x131   : > { %v4991_v27 = vld [vmem:[%s6863_s3 + $0x72c] ss:$16 sps:$4 sm:$0xff]   ;;  %v4986_v29 = vld [vmem:[%s6863_s3 + $0x720] ss:$16 sps:$4 sm:$0xff]   ;;  %v4989_v31 = vld [vmem:[%s6863_s3 + $0x728] ss:$16 sps:$4 sm:$0xff]  }
 0x132   : > { %v4994_v32 = vld [vmem:[%s6863_s3 + $0x744] ss:$16 sps:$4 sm:$0xff]   ;;  %v4997_v33 = vld [vmem:[%s6863_s3 + $0x74c] ss:$16 sps:$4 sm:$0xff]   ;;  %v4992_v34 = vld [vmem:[%s6863_s3 + $0x740] ss:$16 sps:$4 sm:$0xff]  }
 0x133   : > { %1928 = vmatpush1.bf16.msra.mxu0 %v4944_v41  ;;  %2014 = vmatpush1.bf16.msra.mxu1 %v4947_v42  ;;  %v4995_v35 = vld [vmem:[%s6863_s3 + $0x748] ss:$16 sps:$4 sm:$0xff]   ;;  %v5000_v36 = vld [vmem:[%s6863_s3 + $0x764] ss:$16 sps:$4 sm:$0xff]   ;;  %v5003_v37 = vld [vmem:[%s6863_s3 + $0x76c] ss:$16 sps:$4 sm:$0xff]  }
 0x134   : > { %1929 = vmatprep.subr.bf16.mxu0 %v4952_v50  ;;  %2015 = vmatprep.subr.bf16.mxu1 %v4955_v51  ;;  %v4998_v38 = vld [vmem:[%s6863_s3 + $0x760] ss:$16 sps:$4 sm:$0xff]   ;;  %v5001_v39 = vld [vmem:[%s6863_s3 + $0x768] ss:$16 sps:$4 sm:$0xff]   ;;  %v5006_v40 = vld [vmem:[%s6863_s3 + $0x784] ss:$16 sps:$4 sm:$0xff]  }
 0x135   : > { %v5009_v41 = vld [vmem:[%s6863_s3 + $0x78c] ss:$16 sps:$4 sm:$0xff]   ;;  %v5004_v42 = vld [vmem:[%s6863_s3 + $0x780] ss:$16 sps:$4 sm:$0xff]   ;;  %v5007_v43 = vld [vmem:[%s6863_s3 + $0x788] ss:$16 sps:$4 sm:$0xff]  }
 0x136   : > { %v5012_v44 = vld [vmem:[%s6863_s3 + $0x7a4] ss:$16 sps:$4 sm:$0xff]   ;;  %v5015_v45 = vld [vmem:[%s6863_s3 + $0x7ac] ss:$16 sps:$4 sm:$0xff]   ;;  %v5010_v46 = vld [vmem:[%s6863_s3 + $0x7a0] ss:$16 sps:$4 sm:$0xff]  }
 0x137   : > { %1930 = vmatpush1.bf16.msra.mxu0 %v4950_v61  ;;  %2016 = vmatpush1.bf16.msra.mxu1 %v4953_v62  ;;  %v5013_v47 = vld [vmem:[%s6863_s3 + $0x7a8] ss:$16 sps:$4 sm:$0xff]   ;;  %v5018_v48 = vld [vmem:[%s6863_s3 + $0x7c4] ss:$16 sps:$4 sm:$0xff]   ;;  %v5021_v6 = vld [vmem:[%s6863_s3 + $0x7cc] ss:$16 sps:$4 sm:$0xff]  }
 0x138   : > { %1931 = vmatprep.subr.bf16.mxu0 %v4958_v63  ;;  %2017 = vmatprep.subr.bf16.mxu1 %v4961_v0  ;;  %v5016_v49 = vld [vmem:[%s6863_s3 + $0x7c0] ss:$16 sps:$4 sm:$0xff]   ;;  %v5019_v50 = vld [vmem:[%s6863_s3 + $0x7c8] ss:$16 sps:$4 sm:$0xff]   ;;  %v5024_v51 = vld [vmem:[%s6863_s3 + $0x7e4] ss:$16 sps:$4 sm:$0xff]  }
 0x139   : > { %v5027_v53 = vld [vmem:[%s6863_s3 + $0x7ec] ss:$16 sps:$4 sm:$0xff]   ;;  %v5022_v54 = vld [vmem:[%s6863_s3 + $0x7e0] ss:$16 sps:$4 sm:$0xff]   ;;  %v5025_v56 = vld [vmem:[%s6863_s3 + $0x7e8] ss:$16 sps:$4 sm:$0xff]  }
 0x13a   : > { %v5030_v58 = vld [vmem:[%s6863_s3 + $0x4] ss:$16 sps:$4 sm:$0xff]   ;;  %v5033_v60 = vld [vmem:[%s6863_s3 + $0xc] ss:$16 sps:$4 sm:$0xff]   ;;  %v5028_v62 = vld [vmem:[%s6863_s3] ss:$16 sps:$4 sm:$0xff]  }
 0x13b   : > { %1932 = vmatpush1.bf16.msra.mxu0 %v4956_v5  ;;  %2018 = vmatpush1.bf16.msra.mxu1 %v4959_v7  ;;  %v903_v61 = vld [vmem:[#allocation3 + $0x8] sm:$0xff]  ;;  %v5031_v63 = vld [vmem:[%s6863_s3 + $0x8] ss:$16 sps:$4 sm:$0xff]   ;;  %v5039_v7 = vld [vmem:[%s6863_s3 + $0x2c] ss:$16 sps:$4 sm:$0xff]  }
 0x13c   : > { %1933 = vmatprep.subr.bf16.mxu0 %v4964_v8  ;;  %2019 = vmatprep.subr.bf16.mxu1 %v4967_v9  ;;  %v911_v0 = vpack.c.bf16 %v5849_v30, %v903_v61  ;;  %v5036_v5 = vld [vmem:[%s6863_s3 + $0x24] ss:$16 sps:$4 sm:$0xff]   ;;  %v5034_v8 = vld [vmem:[%s6863_s3 + $0x20] ss:$16 sps:$4 sm:$0xff]   ;;  %v5037_v9 = vld [vmem:[%s6863_s3 + $0x28] ss:$16 sps:$4 sm:$0xff]  }
 0x13d   : > { %v5111_v61 = vld [vmem:[%s6863_s3 + $0x1ac] ss:$16 sps:$4 sm:$0xff]  }
 0x13f   : > { %1934 = vmatpush1.bf16.msra.mxu0 %v4962_v10  ;;  %2020 = vmatpush1.bf16.msra.mxu1 %v4965_v11  ;;  %v5042_v10 = vld [vmem:[%s6863_s3 + $0x44] ss:$16 sps:$4 sm:$0xff]   ;;  %v5040_v11 = vld [vmem:[%s6863_s3 + $0x40] ss:$16 sps:$4 sm:$0xff]  }
 0x140   : > { %1935 = vmatprep.subr.bf16.mxu0 %v4970_v12  ;;  %2021 = vmatprep.subr.bf16.mxu1 %v4973_v14  ;;  %v5043_v12 = vld [vmem:[%s6863_s3 + $0x48] ss:$16 sps:$4 sm:$0xff]   ;;  %v5048_v14 = vld [vmem:[%s6863_s3 + $0x64] ss:$16 sps:$4 sm:$0xff]  }
 0x143   : > { %1936 = vmatpush1.bf16.msra.mxu0 %v4968_v15  ;;  %2022 = vmatpush1.bf16.msra.mxu1 %v4971_v16  ;;  %v5051_v15 = vld [vmem:[%s6863_s3 + $0x6c] ss:$16 sps:$4 sm:$0xff]   ;;  %v5046_v16 = vld [vmem:[%s6863_s3 + $0x60] ss:$16 sps:$4 sm:$0xff]  }
 0x144   : > { %1937 = vmatprep.subr.bf16.mxu0 %v4976_v18  ;;  %2023 = vmatprep.subr.bf16.mxu1 %v4979_v19  ;;  %v5049_v18 = vld [vmem:[%s6863_s3 + $0x68] ss:$16 sps:$4 sm:$0xff]   ;;  %v5054_v19 = vld [vmem:[%s6863_s3 + $0x84] ss:$16 sps:$4 sm:$0xff]  }
 0x147   : > { %1938 = vmatpush1.bf16.msra.mxu0 %v4974_v20  ;;  %2024 = vmatpush1.bf16.msra.mxu1 %v4977_v21  ;;  %v5057_v20 = vld [vmem:[%s6863_s3 + $0x8c] ss:$16 sps:$4 sm:$0xff]   ;;  %v5052_v21 = vld [vmem:[%s6863_s3 + $0x80] ss:$16 sps:$4 sm:$0xff]  }
 0x148   : > { %1939 = vmatprep.subr.bf16.mxu0 %v4982_v22  ;;  %2025 = vmatprep.subr.bf16.mxu1 %v4985_v23  ;;  %v5055_v22 = vld [vmem:[%s6863_s3 + $0x88] ss:$16 sps:$4 sm:$0xff]   ;;  %v5060_v23 = vld [vmem:[%s6863_s3 + $0xa4] ss:$16 sps:$4 sm:$0xff]  }
 0x14b   : > { %1940 = vmatpush1.bf16.msra.mxu0 %v4980_v24  ;;  %2026 = vmatpush1.bf16.msra.mxu1 %v4983_v25  ;;  %v5063_v24 = vld [vmem:[%s6863_s3 + $0xac] ss:$16 sps:$4 sm:$0xff]   ;;  %v5058_v25 = vld [vmem:[%s6863_s3 + $0xa0] ss:$16 sps:$4 sm:$0xff]  }
 0x14c   : > { %1941 = vmatprep.subr.bf16.mxu0 %v4988_v26  ;;  %2027 = vmatprep.subr.bf16.mxu1 %v4991_v27  ;;  %v5061_v26 = vld [vmem:[%s6863_s3 + $0xa8] ss:$16 sps:$4 sm:$0xff]   ;;  %v5066_v27 = vld [vmem:[%s6863_s3 + $0xc4] ss:$16 sps:$4 sm:$0xff]  }
 0x14f   : > { %1942 = vmatpush1.bf16.msra.mxu0 %v4986_v29  ;;  %2028 = vmatpush1.bf16.msra.mxu1 %v4989_v31  ;;  %v5069_v29 = vld [vmem:[%s6863_s3 + $0xcc] ss:$16 sps:$4 sm:$0xff]   ;;  %v5064_v31 = vld [vmem:[%s6863_s3 + $0xc0] ss:$16 sps:$4 sm:$0xff]  }
 0x150   : > { %1943 = vmatprep.subr.bf16.mxu0 %v4994_v32  ;;  %2029 = vmatprep.subr.bf16.mxu1 %v4997_v33  ;;  %v5067_v32 = vld [vmem:[%s6863_s3 + $0xc8] ss:$16 sps:$4 sm:$0xff]   ;;  %v5072_v33 = vld [vmem:[%s6863_s3 + $0xe4] ss:$16 sps:$4 sm:$0xff]  }
 0x153   : > { %1944 = vmatpush1.bf16.msra.mxu0 %v4992_v34  ;;  %2030 = vmatpush1.bf16.msra.mxu1 %v4995_v35  ;;  %v5075_v34 = vld [vmem:[%s6863_s3 + $0xec] ss:$16 sps:$4 sm:$0xff]   ;;  %v5070_v35 = vld [vmem:[%s6863_s3 + $0xe0] ss:$16 sps:$4 sm:$0xff]  }
 0x154   : > { %1945 = vmatprep.subr.bf16.mxu0 %v5000_v36  ;;  %2031 = vmatprep.subr.bf16.mxu1 %v5003_v37  ;;  %v5073_v36 = vld [vmem:[%s6863_s3 + $0xe8] ss:$16 sps:$4 sm:$0xff]   ;;  %v5078_v37 = vld [vmem:[%s6863_s3 + $0x104] ss:$16 sps:$4 sm:$0xff]  }
 0x157   : > { %1946 = vmatpush1.bf16.msra.mxu0 %v4998_v38  ;;  %2032 = vmatpush1.bf16.msra.mxu1 %v5001_v39  ;;  %v5081_v38 = vld [vmem:[%s6863_s3 + $0x10c] ss:$16 sps:$4 sm:$0xff]   ;;  %v5076_v39 = vld [vmem:[%s6863_s3 + $0x100] ss:$16 sps:$4 sm:$0xff]  }
 0x158   : > { %1947 = vmatprep.subr.bf16.mxu0 %v5006_v40  ;;  %2033 = vmatprep.subr.bf16.mxu1 %v5009_v41  ;;  %v5079_v40 = vld [vmem:[%s6863_s3 + $0x108] ss:$16 sps:$4 sm:$0xff]   ;;  %v5084_v41 = vld [vmem:[%s6863_s3 + $0x124] ss:$16 sps:$4 sm:$0xff]  }
 0x15b   : > { %1948 = vmatpush1.bf16.msra.mxu0 %v5004_v42  ;;  %2034 = vmatpush1.bf16.msra.mxu1 %v5007_v43  ;;  %v5087_v42 = vld [vmem:[%s6863_s3 + $0x12c] ss:$16 sps:$4 sm:$0xff]   ;;  %v5082_v43 = vld [vmem:[%s6863_s3 + $0x120] ss:$16 sps:$4 sm:$0xff]  }
 0x15c   : > { %1949 = vmatprep.subr.bf16.mxu0 %v5012_v44  ;;  %2035 = vmatprep.subr.bf16.mxu1 %v5015_v45  ;;  %v5085_v44 = vld [vmem:[%s6863_s3 + $0x128] ss:$16 sps:$4 sm:$0xff]   ;;  %v5090_v45 = vld [vmem:[%s6863_s3 + $0x144] ss:$16 sps:$4 sm:$0xff]  }
 0x15f   : > { %1950 = vmatpush1.bf16.msra.mxu0 %v5010_v46  ;;  %2036 = vmatpush1.bf16.msra.mxu1 %v5013_v47  ;;  %v5093_v46 = vld [vmem:[%s6863_s3 + $0x14c] ss:$16 sps:$4 sm:$0xff]   ;;  %v5088_v47 = vld [vmem:[%s6863_s3 + $0x140] ss:$16 sps:$4 sm:$0xff]  }
 0x160   : > { %1951 = vmatprep.subr.bf16.mxu0 %v5018_v48  ;;  %2037 = vmatprep.subr.bf16.mxu1 %v5021_v6  ;;  %v5091_v48 = vld [vmem:[%s6863_s3 + $0x148] ss:$16 sps:$4 sm:$0xff]   ;;  %v5096_v6 = vld [vmem:[%s6863_s3 + $0x164] ss:$16 sps:$4 sm:$0xff]  }
 0x163   : > { %1952 = vmatpush1.bf16.msra.mxu0 %v5016_v49  ;;  %2038 = vmatpush1.bf16.msra.mxu1 %v5019_v50  ;;  %v5099_v49 = vld [vmem:[%s6863_s3 + $0x16c] ss:$16 sps:$4 sm:$0xff]   ;;  %v5094_v50 = vld [vmem:[%s6863_s3 + $0x160] ss:$16 sps:$4 sm:$0xff]  }
 0x164   : > { %1953 = vmatprep.subr.bf16.mxu0 %v5024_v51  ;;  %2039 = vmatprep.subr.bf16.mxu1 %v5027_v53  ;;  %v5097_v51 = vld [vmem:[%s6863_s3 + $0x168] ss:$16 sps:$4 sm:$0xff]   ;;  %v5102_v53 = vld [vmem:[%s6863_s3 + $0x184] ss:$16 sps:$4 sm:$0xff]  }
 0x167   : > { %1954 = vmatpush1.bf16.msra.mxu0 %v5022_v54  ;;  %2040 = vmatpush1.bf16.msra.mxu1 %v5025_v56  ;;  %v5105_v54 = vld [vmem:[%s6863_s3 + $0x18c] ss:$16 sps:$4 sm:$0xff]   ;;  %v5100_v56 = vld [vmem:[%s6863_s3 + $0x180] ss:$16 sps:$4 sm:$0xff]  }
 0x168   : > { %2692 = vmatprep.subr.bf16.mxu0 %v5030_v58  ;;  %2778 = vmatprep.subr.bf16.mxu1 %v5033_v60  ;;  %v5103_v58 = vld [vmem:[%s6863_s3 + $0x188] ss:$16 sps:$4 sm:$0xff]   ;;  %v5108_v60 = vld [vmem:[%s6863_s3 + $0x1a4] ss:$16 sps:$4 sm:$0xff]  }
 0x16a   : > { %1956 = vmatmul.mubr.bf16.vlgmr.msra.gmra.mrb[4].mxu0 %v5901_v52  ;;  %2042 = vmatmul.mubr.bf16.vlgmr.msra.gmra.mrb[4].mxu1 %v5901_v52  ;;  %v5045_v52 = vld [vmem:[%s6863_s3 + $0x4c] ss:$16 sps:$4 sm:$0xff]  }
 0x16b   : > { %2693 = vmatpush1.bf16.msra.mxu0 %v5028_v62  ;;  %2724 = vmatprep.mubr.bf16.mxu0 %v911_v0  ;;  %v5106_v62 = vld [vmem:[%s6863_s3 + $0x1a0] ss:$16 sps:$4 sm:$0xff]  }
 0x16c   : > { %2779 = vmatpush1.bf16.msra.mxu1 %v5031_v63  ;;  %2810 = vmatprep.mubr.bf16.mxu1 %v911_v0  ;;  %v5109_v63 = vld [vmem:[%s6863_s3 + $0x1a8] ss:$16 sps:$4 sm:$0xff]   ;;  %v5114_v0 = vld [vmem:[%s6863_s3 + $0x1c4] ss:$16 sps:$4 sm:$0xff]  }
 0x16d   : > { %2694 = vmatprep.subr.bf16.mxu0 %v5036_v5  ;;  %2780 = vmatprep.subr.bf16.mxu1 %v5039_v7  ;;  %v5117_v5 = vld [vmem:[%s6863_s3 + $0x1cc] ss:$16 sps:$4 sm:$0xff]   ;;  %v5112_v7 = vld [vmem:[%s6863_s3 + $0x1c0] ss:$16 sps:$4 sm:$0xff]  }
 0x16f   : > { %2695 = vmatpush1.bf16.msra.mxu0 %v5034_v8  ;;  %v5115_v8 = vld [vmem:[%s6863_s3 + $0x1c8] ss:$16 sps:$4 sm:$0xff]  }
 0x170   : > { %2781 = vmatpush1.bf16.msra.mxu1 %v5037_v9  ;;  %2696 = vmatprep.subr.bf16.mxu0 %v5042_v10  ;;  %v5120_v9 = vld [vmem:[%s6863_s3 + $0x1e4] ss:$16 sps:$4 sm:$0xff]   ;;  %v5123_v10 = vld [vmem:[%s6863_s3 + $0x1ec] ss:$16 sps:$4 sm:$0xff]  }
 0x171   : > { %2782 = vmatprep.subr.bf16.mxu1 %v5045_v52  ;;  %v5118_v52 = vld [vmem:[%s6863_s3 + $0x1e0] ss:$16 sps:$4 sm:$0xff]  }
 0x173   : > { %2697 = vmatpush1.bf16.msra.mxu0 %v5040_v11  ;;  %v5121_v11 = vld [vmem:[%s6863_s3 + $0x1e8] ss:$16 sps:$4 sm:$0xff]  }
 0x174   : > { %2783 = vmatpush1.bf16.msra.mxu1 %v5043_v12  ;;  %2698 = vmatprep.subr.bf16.mxu0 %v5048_v14  ;;  %v5126_v12 = vld [vmem:[%s6863_s3 + $0x204] ss:$16 sps:$4 sm:$0xff]   ;;  %v902_v14 = vld [vmem:[#allocation3] sm:$0xff] }
 0x175   : > { %2784 = vmatprep.subr.bf16.mxu1 %v5051_v15  ;;  %v5129_v15 = vld [vmem:[%s6863_s3 + $0x20c] ss:$16 sps:$4 sm:$0xff]  }
 0x177   : > { %2699 = vmatpush1.bf16.msra.mxu0 %v5046_v16  ;;  %v5124_v16 = vld [vmem:[%s6863_s3 + $0x200] ss:$16 sps:$4 sm:$0xff]  }
 0x178   : > { %2785 = vmatpush1.bf16.msra.mxu1 %v5049_v18  ;;  %2700 = vmatprep.subr.bf16.mxu0 %v5054_v19  ;;  %v905_v18 = vld [vmem:[#allocation3 + $0x18] sm:$0xff]  ;;  %v910_v19 = vpack.c.bf16 %v5845_v28, %v902_v14 }
 0x179   : > { %2786 = vmatprep.subr.bf16.mxu1 %v5057_v20  ;;  %v5127_v20 = vld [vmem:[%s6863_s3 + $0x208] ss:$16 sps:$4 sm:$0xff]   ;;  %v5130_v28 = vld [vmem:[%s6863_s3 + $0x220] ss:$16 sps:$4 sm:$0xff]   ;;  %v5204_v14 = vld [vmem:[%s6863_s3 + $0x3a4] ss:$16 sps:$4 sm:$0xff]  }
 0x17b   : > { %2701 = vmatpush1.bf16.msra.mxu0 %v5052_v21  ;;  %v5132_v21 = vld [vmem:[%s6863_s3 + $0x224] ss:$16 sps:$4 sm:$0xff]  }
 0x17c   : > { %2787 = vmatpush1.bf16.msra.mxu1 %v5055_v22  ;;  %2702 = vmatprep.subr.bf16.mxu0 %v5060_v23  ;;  %v913_v22 = vpack.c.bf16 %v5857_v59, %v905_v18  ;;  %v5135_v23 = vld [vmem:[%s6863_s3 + $0x22c] ss:$16 sps:$4 sm:$0xff]   ;;  %v5138_v59 = vld [vmem:[%s6863_s3 + $0x244] ss:$16 sps:$4 sm:$0xff]   ;;  %v5205_v18 = vld [vmem:[%s6863_s3 + $0x3a8] ss:$16 sps:$4 sm:$0xff]  }
 0x17d   : > { %2788 = vmatprep.subr.bf16.mxu1 %v5063_v24  ;;  %v5133_v24 = vld [vmem:[%s6863_s3 + $0x228] ss:$16 sps:$4 sm:$0xff]  }
 0x17f   : > { %2703 = vmatpush1.bf16.msra.mxu0 %v5058_v25  ;;  %v5141_v25 = vld [vmem:[%s6863_s3 + $0x24c] ss:$16 sps:$4 sm:$0xff]  }
 0x180   : > { %2789 = vmatpush1.bf16.msra.mxu1 %v5061_v26  ;;  %2704 = vmatprep.subr.bf16.mxu0 %v5066_v27  ;;  %v5136_v26 = vld [vmem:[%s6863_s3 + $0x240] ss:$16 sps:$4 sm:$0xff]   ;;  %v5139_v27 = vld [vmem:[%s6863_s3 + $0x248] ss:$16 sps:$4 sm:$0xff]  }
 0x181   : > { %2790 = vmatprep.subr.bf16.mxu1 %v5069_v29  ;;  %v5144_v29 = vld [vmem:[%s6863_s3 + $0x264] ss:$16 sps:$4 sm:$0xff]  }
 0x183   : > { %2705 = vmatpush1.bf16.msra.mxu0 %v5064_v31  ;;  %v5147_v31 = vld [vmem:[%s6863_s3 + $0x26c] ss:$16 sps:$4 sm:$0xff]  }
 0x184   : > { %2791 = vmatpush1.bf16.msra.mxu1 %v5067_v32  ;;  %2706 = vmatprep.subr.bf16.mxu0 %v5072_v33  ;;  %v5142_v32 = vld [vmem:[%s6863_s3 + $0x260] ss:$16 sps:$4 sm:$0xff]   ;;  %v5145_v33 = vld [vmem:[%s6863_s3 + $0x268] ss:$16 sps:$4 sm:$0xff]  }
 0x185   : > { %2792 = vmatprep.subr.bf16.mxu1 %v5075_v34  ;;  %v5150_v34 = vld [vmem:[%s6863_s3 + $0x284] ss:$16 sps:$4 sm:$0xff]  }
 0x187   : > { %2707 = vmatpush1.bf16.msra.mxu0 %v5070_v35  ;;  %v5153_v35 = vld [vmem:[%s6863_s3 + $0x28c] ss:$16 sps:$4 sm:$0xff]  }
 0x188   : > { %2793 = vmatpush1.bf16.msra.mxu1 %v5073_v36  ;;  %2708 = vmatprep.subr.bf16.mxu0 %v5078_v37  ;;  %v5148_v36 = vld [vmem:[%s6863_s3 + $0x280] ss:$16 sps:$4 sm:$0xff]   ;;  %v5151_v37 = vld [vmem:[%s6863_s3 + $0x288] ss:$16 sps:$4 sm:$0xff]  }
 0x189   : > { %2794 = vmatprep.subr.bf16.mxu1 %v5081_v38  ;;  %v5156_v38 = vld [vmem:[%s6863_s3 + $0x2a4] ss:$16 sps:$4 sm:$0xff]  }
 0x18b   : > { %2709 = vmatpush1.bf16.msra.mxu0 %v5076_v39  ;;  %v5159_v39 = vld [vmem:[%s6863_s3 + $0x2ac] ss:$16 sps:$4 sm:$0xff]  }
 0x18c   : > { %2795 = vmatpush1.bf16.msra.mxu1 %v5079_v40  ;;  %2710 = vmatprep.subr.bf16.mxu0 %v5084_v41  ;;  %v5154_v40 = vld [vmem:[%s6863_s3 + $0x2a0] ss:$16 sps:$4 sm:$0xff]   ;;  %v5157_v41 = vld [vmem:[%s6863_s3 + $0x2a8] ss:$16 sps:$4 sm:$0xff]  }
 0x18d   : > { %2796 = vmatprep.subr.bf16.mxu1 %v5087_v42  ;;  %v5162_v42 = vld [vmem:[%s6863_s3 + $0x2c4] ss:$16 sps:$4 sm:$0xff]  }
 0x18f   : > { %2711 = vmatpush1.bf16.msra.mxu0 %v5082_v43  ;;  %v5165_v43 = vld [vmem:[%s6863_s3 + $0x2cc] ss:$16 sps:$4 sm:$0xff]  }
 0x190   : > { %2797 = vmatpush1.bf16.msra.mxu1 %v5085_v44  ;;  %2712 = vmatprep.subr.bf16.mxu0 %v5090_v45  ;;  %v5160_v44 = vld [vmem:[%s6863_s3 + $0x2c0] ss:$16 sps:$4 sm:$0xff]   ;;  %v5163_v45 = vld [vmem:[%s6863_s3 + $0x2c8] ss:$16 sps:$4 sm:$0xff]  }
 0x191   : > { %2798 = vmatprep.subr.bf16.mxu1 %v5093_v46  ;;  %v5168_v46 = vld [vmem:[%s6863_s3 + $0x2e4] ss:$16 sps:$4 sm:$0xff]  }
 0x193   : > { %2713 = vmatpush1.bf16.msra.mxu0 %v5088_v47  ;;  %v5171_v47 = vld [vmem:[%s6863_s3 + $0x2ec] ss:$16 sps:$4 sm:$0xff]  }
 0x194   : > { %2799 = vmatpush1.bf16.msra.mxu1 %v5091_v48  ;;  %2714 = vmatprep.subr.bf16.mxu0 %v5096_v6  ;;  %v5166_v48 = vld [vmem:[%s6863_s3 + $0x2e0] ss:$16 sps:$4 sm:$0xff]   ;;  %v5169_v6 = vld [vmem:[%s6863_s3 + $0x2e8] ss:$16 sps:$4 sm:$0xff]  }
 0x195   : > { %2800 = vmatprep.subr.bf16.mxu1 %v5099_v49  ;;  %v5174_v49 = vld [vmem:[%s6863_s3 + $0x304] ss:$16 sps:$4 sm:$0xff]  }
 0x197   : > { %2715 = vmatpush1.bf16.msra.mxu0 %v5094_v50  ;;  %v5177_v50 = vld [vmem:[%s6863_s3 + $0x30c] ss:$16 sps:$4 sm:$0xff]  }
 0x198   : > { %2801 = vmatpush1.bf16.msra.mxu1 %v5097_v51  ;;  %2716 = vmatprep.subr.bf16.mxu0 %v5102_v53  ;;  %v5172_v51 = vld [vmem:[%s6863_s3 + $0x300] ss:$16 sps:$4 sm:$0xff]   ;;  %v5175_v53 = vld [vmem:[%s6863_s3 + $0x308] ss:$16 sps:$4 sm:$0xff]  }
 0x199   : > { %2802 = vmatprep.subr.bf16.mxu1 %v5105_v54  ;;  %v5180_v54 = vld [vmem:[%s6863_s3 + $0x324] ss:$16 sps:$4 sm:$0xff]  }
 0x19b   : > { %2717 = vmatpush1.bf16.msra.mxu0 %v5100_v56  ;;  %v5183_v56 = vld [vmem:[%s6863_s3 + $0x32c] ss:$16 sps:$4 sm:$0xff]  }
 0x19c   : > { %2803 = vmatpush1.bf16.msra.mxu1 %v5103_v58  ;;  %2718 = vmatprep.subr.bf16.mxu0 %v5108_v60  ;;  %v5178_v58 = vld [vmem:[%s6863_s3 + $0x320] ss:$16 sps:$4 sm:$0xff]   ;;  %v5181_v60 = vld [vmem:[%s6863_s3 + $0x328] ss:$16 sps:$4 sm:$0xff]  }
 0x19d   : > { %2804 = vmatprep.subr.bf16.mxu1 %v5111_v61  ;;  %v5186_v61 = vld [vmem:[%s6863_s3 + $0x344] ss:$16 sps:$4 sm:$0xff]  }
 0x19f   : > { %2719 = vmatpush1.bf16.msra.mxu0 %v5106_v62  ;;  %v5189_v62 = vld [vmem:[%s6863_s3 + $0x34c] ss:$16 sps:$4 sm:$0xff]  }
 0x1a0   : > { %2805 = vmatpush1.bf16.msra.mxu1 %v5109_v63  ;;  %2720 = vmatprep.subr.bf16.mxu0 %v5114_v0  ;;  %v5184_v63 = vld [vmem:[%s6863_s3 + $0x340] ss:$16 sps:$4 sm:$0xff]   ;;  %v5187_v0 = vld [vmem:[%s6863_s3 + $0x348] ss:$16 sps:$4 sm:$0xff]  }
 0x1a1   : > { %2806 = vmatprep.subr.bf16.mxu1 %v5117_v5  ;;  %v5192_v5 = vld [vmem:[%s6863_s3 + $0x364] ss:$16 sps:$4 sm:$0xff]  }
 0x1a3   : > { %2721 = vmatpush1.bf16.msra.mxu0 %v5112_v7  ;;  %v5195_v7 = vld [vmem:[%s6863_s3 + $0x36c] ss:$16 sps:$4 sm:$0xff]  }
 0x1a4   : > { %2807 = vmatpush1.bf16.msra.mxu1 %v5115_v8  ;;  %2722 = vmatprep.subr.bf16.mxu0 %v5120_v9  ;;  %v5190_v8 = vld [vmem:[%s6863_s3 + $0x360] ss:$16 sps:$4 sm:$0xff]   ;;  %v5193_v9 = vld [vmem:[%s6863_s3 + $0x368] ss:$16 sps:$4 sm:$0xff]  }
 0x1a5   : > { %2808 = vmatprep.subr.bf16.mxu1 %v5123_v10  ;;  %v5198_v10 = vld [vmem:[%s6863_s3 + $0x384] ss:$16 sps:$4 sm:$0xff]  }
 0x1a7   : > { %2723 = vmatpush1.bf16.msra.mxu0 %v5118_v52  ;;  %v5201_v52 = vld [vmem:[%s6863_s3 + $0x38c] ss:$16 sps:$4 sm:$0xff]  }
 0x1a8   : > { %2809 = vmatpush1.bf16.msra.mxu1 %v5121_v11  ;;  %2735 = vmatprep.subr.bf16.mxu0 %v5126_v12  ;;  %v5196_v11 = vld [vmem:[%s6863_s3 + $0x380] ss:$16 sps:$4 sm:$0xff]   ;;  %v5199_v12 = vld [vmem:[%s6863_s3 + $0x388] ss:$16 sps:$4 sm:$0xff]  }
 0x1a9   : > { %2821 = vmatprep.subr.bf16.mxu1 %v5129_v15  ;;  %v5207_v15 = vld [vmem:[%s6863_s3 + $0x3ac] ss:$16 sps:$4 sm:$0xff]  }
 0x1aa   : > { %2725 = vmatmul.mubr.bf16.vlgmr.msra.gmra.mrb[4].mxu0 %v910_v19 }
 0x1ab   : > { %2811 = vmatmul.mubr.bf16.vlgmr.msra.gmra.mrb[4].mxu1 %v910_v19  ;;  %2736 = vmatpush1.bf16.msra.mxu0 %v5124_v16  ;;  %v5202_v16 = vld [vmem:[%s6863_s3 + $0x3a0] ss:$16 sps:$4 sm:$0xff]   ;;  %v5210_v19 = vld [vmem:[%s6863_s3 + $0x3c4] ss:$16 sps:$4 sm:$0xff]  }
 0x1ac   : > { %2767 = vmatprep.mubr.bf16.mxu0 %v913_v22  ;;  %2822 = vmatpush1.bf16.msra.mxu1 %v5127_v20  ;;  %v5213_v20 = vld [vmem:[%s6863_s3 + $0x3cc] ss:$16 sps:$4 sm:$0xff]  }
 0x1ad   : > { %2853 = vmatprep.mubr.bf16.mxu1 %v913_v22  ;;  %2737 = vmatprep.subr.bf16.mxu0 %v5132_v21  ;;  %v5208_v21 = vld [vmem:[%s6863_s3 + $0x3c0] ss:$16 sps:$4 sm:$0xff]   ;;  %v5211_v22 = vld [vmem:[%s6863_s3 + $0x3c8] ss:$16 sps:$4 sm:$0xff]  }
 0x1ae   : > { %2823 = vmatprep.subr.bf16.mxu1 %v5135_v23  ;;  %v5216_v23 = vld [vmem:[%s6863_s3 + $0x3e4] ss:$16 sps:$4 sm:$0xff]  }
 0x1af   : > { %2738 = vmatpush1.bf16.msra.mxu0 %v5130_v28  ;;  %v2869_v28 = vld [vmem:[#allocation3 + $0x48] sm:$0x3] }
 0x1b0   : > { %2824 = vmatpush1.bf16.msra.mxu1 %v5133_v24  ;;  %2739 = vmatprep.subr.bf16.mxu0 %v5138_v59  ;;  %v5219_v24 = vld [vmem:[%s6863_s3 + $0x3ec] ss:$16 sps:$4 sm:$0xff]   ;;  %v2865_v59 = vld [vmem:[#allocation3 + $0x8] sm:$0xfc] }
 0x1b1   : > { %2825 = vmatprep.subr.bf16.mxu1 %v5141_v25  ;;  %v5214_v25 = vld [vmem:[%s6863_s3 + $0x3e0] ss:$16 sps:$4 sm:$0xff]  }
 0x1b3   : > { %2740 = vmatpush1.bf16.msra.mxu0 %v5136_v26  ;;  %v2877_v26 = vpack.c.bf16 %v2869_v28, %v2869_v28  ;;  %v5291_v28 = vld [vmem:[%s6863_s3 + $0x96c] ss:$16 sps:$4 sm:$0xff]  }
 0x1b4   : > { %2826 = vmatpush1.bf16.msra.mxu1 %v5139_v27  ;;  %2741 = vmatprep.subr.bf16.mxu0 %v5144_v29  ;;  %v5217_v27 = vld [vmem:[%s6863_s3 + $0x3e8] ss:$16 sps:$4 sm:$0xff]   ;;  %v5222_v29 = vld [vmem:[%s6863_s3 + $0x804] ss:$16 sps:$4 sm:$0xff]  }
 0x1b5   : > { %2827 = vmatprep.subr.bf16.mxu1 %v5147_v31  ;;  %v904_v31 = vld [vmem:[#allocation3 + $0x10] sm:$0xff] }
 0x1b7   : > { %2742 = vmatpush1.bf16.msra.mxu0 %v5142_v32  ;;  %v5225_v32 = vld [vmem:[%s6863_s3 + $0x80c] ss:$16 sps:$4 sm:$0xff]  }
 0x1b8   : > { %2828 = vmatpush1.bf16.msra.mxu1 %v5145_v33  ;;  %2743 = vmatprep.subr.bf16.mxu0 %v5150_v34  ;;  %v2873_v33 = vpack.c.bf16 %v5849_v30, %v2865_v59  ;;  %v5220_v34 = vld [vmem:[%s6863_s3 + $0x800] ss:$16 sps:$4 sm:$0xff]   ;;  %v5228_v30 = vld [vmem:[%s6863_s3 + $0x824] ss:$16 sps:$4 sm:$0xff]   ;;  %v5289_v59 = vld [vmem:[%s6863_s3 + $0x968] ss:$16 sps:$4 sm:$0xff]  }
 0x1b9   : > { %2829 = vmatprep.subr.bf16.mxu1 %v5153_v35  ;;  %v3022_v35 = vrot.slane %v2877_v26, 1  ;;  %v5297_v26 = vld [vmem:[%s6863_s3 + $0x98c] ss:$16 sps:$4 sm:$0xff]  }
 0x1bb   : > { %2744 = vmatpush1.bf16.msra.mxu0 %v5148_v36  ;;  %v912_v36 = vpack.c.bf16 %v5854_v55, %v904_v31  ;;  %v5300_v31 = vld [vmem:[%s6863_s3 + $0x9a4] ss:$16 sps:$4 sm:$0xff]  }
 0x1bc   : > { %2830 = vmatpush1.bf16.msra.mxu1 %v5151_v37  ;;  %2745 = vmatprep.subr.bf16.mxu0 %v5156_v38  ;;  %v5223_v37 = vld [vmem:[%s6863_s3 + $0x808] ss:$16 sps:$4 sm:$0xff]   ;;  %v3021_v38 = vrot.slane %v2873_v33, 1  ;;  %v5298_v33 = vld [vmem:[%s6863_s3 + $0x9a0] ss:$16 sps:$4 sm:$0xff]  }
 0x1bd   : > { %2831 = vmatprep.subr.bf16.mxu1 %v5159_v39  ;;  %v5231_v39 = vld [vmem:[%s6863_s3 + $0x82c] ss:$16 sps:$4 sm:$0xff]  }
 0x1be   : > { %v3023_v55 = vsel %vm3017_vm5, %v3021_v38, %v3022_v35  ;;  %v5306_v35 = vld [vmem:[%s6863_s3 + $0x9c4] ss:$16 sps:$4 sm:$0xff]   ;;  %v5304_v38 = vld [vmem:[%s6863_s3 + $0x9c0] ss:$16 sps:$4 sm:$0xff]  }
 0x1bf   : > { %2746 = vmatpush1.bf16.msra.mxu0 %v5154_v40  ;;  %v5226_v40 = vld [vmem:[%s6863_s3 + $0x820] ss:$16 sps:$4 sm:$0xff]  }
 0x1c0   : > { %2832 = vmatpush1.bf16.msra.mxu1 %v5157_v41  ;;  %2747 = vmatprep.subr.bf16.mxu0 %v5162_v42  ;;  %v5229_v41 = vld [vmem:[%s6863_s3 + $0x828] ss:$16 sps:$4 sm:$0xff]   ;;  %v5234_v42 = vld [vmem:[%s6863_s3 + $0x844] ss:$16 sps:$4 sm:$0xff]  }
 0x1c1   : > { %2833 = vmatprep.subr.bf16.mxu1 %v5165_v43  ;;  %v5237_v43 = vld [vmem:[%s6863_s3 + $0x84c] ss:$16 sps:$4 sm:$0xff]  }
 0x1c3   : > { %2748 = vmatpush1.bf16.msra.mxu0 %v5160_v44  ;;  %v5232_v44 = vld [vmem:[%s6863_s3 + $0x840] ss:$16 sps:$4 sm:$0xff]  }
 0x1c4   : > { %2834 = vmatpush1.bf16.msra.mxu1 %v5163_v45  ;;  %2749 = vmatprep.subr.bf16.mxu0 %v5168_v46  ;;  %v5235_v45 = vld [vmem:[%s6863_s3 + $0x848] ss:$16 sps:$4 sm:$0xff]   ;;  %v5240_v46 = vld [vmem:[%s6863_s3 + $0x864] ss:$16 sps:$4 sm:$0xff]  }
 0x1c5   : > { %2835 = vmatprep.subr.bf16.mxu1 %v5171_v47  ;;  %v5243_v47 = vld [vmem:[%s6863_s3 + $0x86c] ss:$16 sps:$4 sm:$0xff]  }
 0x1c7   : > { %2750 = vmatpush1.bf16.msra.mxu0 %v5166_v48  ;;  %v5238_v48 = vld [vmem:[%s6863_s3 + $0x860] ss:$16 sps:$4 sm:$0xff]  }
 0x1c8   : > { %2836 = vmatpush1.bf16.msra.mxu1 %v5169_v6  ;;  %2751 = vmatprep.subr.bf16.mxu0 %v5174_v49  ;;  %v5241_v6 = vld [vmem:[%s6863_s3 + $0x868] ss:$16 sps:$4 sm:$0xff]   ;;  %v5246_v49 = vld [vmem:[%s6863_s3 + $0x884] ss:$16 sps:$4 sm:$0xff]  }
 0x1c9   : > { %2837 = vmatprep.subr.bf16.mxu1 %v5177_v50  ;;  %v5249_v50 = vld [vmem:[%s6863_s3 + $0x88c] ss:$16 sps:$4 sm:$0xff]  }
 0x1cb   : > { %2752 = vmatpush1.bf16.msra.mxu0 %v5172_v51  ;;  %v5244_v51 = vld [vmem:[%s6863_s3 + $0x880] ss:$16 sps:$4 sm:$0xff]  }
 0x1cc   : > { %2838 = vmatpush1.bf16.msra.mxu1 %v5175_v53  ;;  %2753 = vmatprep.subr.bf16.mxu0 %v5180_v54  ;;  %v5247_v53 = vld [vmem:[%s6863_s3 + $0x888] ss:$16 sps:$4 sm:$0xff]   ;;  %v5252_v54 = vld [vmem:[%s6863_s3 + $0x8a4] ss:$16 sps:$4 sm:$0xff]  }
 0x1cd   : > { %2839 = vmatprep.subr.bf16.mxu1 %v5183_v56  ;;  %v5255_v56 = vld [vmem:[%s6863_s3 + $0x8ac] ss:$16 sps:$4 sm:$0xff]  }
 0x1cf   : > { %2754 = vmatpush1.bf16.msra.mxu0 %v5178_v58  ;;  %v5250_v58 = vld [vmem:[%s6863_s3 + $0x8a0] ss:$16 sps:$4 sm:$0xff]  }
 0x1d0   : > { %2840 = vmatpush1.bf16.msra.mxu1 %v5181_v60  ;;  %2755 = vmatprep.subr.bf16.mxu0 %v5186_v61  ;;  %v5253_v60 = vld [vmem:[%s6863_s3 + $0x8a8] ss:$16 sps:$4 sm:$0xff]   ;;  %v5258_v61 = vld [vmem:[%s6863_s3 + $0x8c4] ss:$16 sps:$4 sm:$0xff]  }
 0x1d1   : > { %2841 = vmatprep.subr.bf16.mxu1 %v5189_v62  ;;  %v5261_v62 = vld [vmem:[%s6863_s3 + $0x8cc] ss:$16 sps:$4 sm:$0xff]  }
 0x1d3   : > { %2756 = vmatpush1.bf16.msra.mxu0 %v5184_v63  ;;  %v5256_v63 = vld [vmem:[%s6863_s3 + $0x8c0] ss:$16 sps:$4 sm:$0xff]  }
 0x1d4   : > { %2842 = vmatpush1.bf16.msra.mxu1 %v5187_v0  ;;  %2757 = vmatprep.subr.bf16.mxu0 %v5192_v5  ;;  %v5259_v0 = vld [vmem:[%s6863_s3 + $0x8c8] ss:$16 sps:$4 sm:$0xff]   ;;  %v5264_v5 = vld [vmem:[%s6863_s3 + $0x8e4] ss:$16 sps:$4 sm:$0xff]  }
 0x1d5   : > { %2843 = vmatprep.subr.bf16.mxu1 %v5195_v7  ;;  %v5267_v7 = vld [vmem:[%s6863_s3 + $0x8ec] ss:$16 sps:$4 sm:$0xff]  }
 0x1d7   : > { %2758 = vmatpush1.bf16.msra.mxu0 %v5190_v8  ;;  %v5262_v8 = vld [vmem:[%s6863_s3 + $0x8e0] ss:$16 sps:$4 sm:$0xff]  }
 0x1d8   : > { %2844 = vmatpush1.bf16.msra.mxu1 %v5193_v9  ;;  %2759 = vmatprep.subr.bf16.mxu0 %v5198_v10  ;;  %v5265_v9 = vld [vmem:[%s6863_s3 + $0x8e8] ss:$16 sps:$4 sm:$0xff]   ;;  %v5270_v10 = vld [vmem:[%s6863_s3 + $0x904] ss:$16 sps:$4 sm:$0xff]  }
 0x1d9   : > { %2845 = vmatprep.subr.bf16.mxu1 %v5201_v52  ;;  %v5273_v52 = vld [vmem:[%s6863_s3 + $0x90c] ss:$16 sps:$4 sm:$0xff]  }
 0x1db   : > { %2760 = vmatpush1.bf16.msra.mxu0 %v5196_v11  ;;  %v5268_v11 = vld [vmem:[%s6863_s3 + $0x900] ss:$16 sps:$4 sm:$0xff]  }
 0x1dc   : > { %2846 = vmatpush1.bf16.msra.mxu1 %v5199_v12  ;;  %2761 = vmatprep.subr.bf16.mxu0 %v5204_v14  ;;  %v5271_v12 = vld [vmem:[%s6863_s3 + $0x908] ss:$16 sps:$4 sm:$0xff]   ;;  %v5276_v14 = vld [vmem:[%s6863_s3 + $0x924] ss:$16 sps:$4 sm:$0xff]  }
 0x1dd   : > { %2847 = vmatprep.subr.bf16.mxu1 %v5207_v15  ;;  %v5279_v15 = vld [vmem:[%s6863_s3 + $0x92c] ss:$16 sps:$4 sm:$0xff]  }
 0x1df   : > { %2762 = vmatpush1.bf16.msra.mxu0 %v5202_v16  ;;  %v5274_v16 = vld [vmem:[%s6863_s3 + $0x920] ss:$16 sps:$4 sm:$0xff]  }
 0x1e0   : > { %2848 = vmatpush1.bf16.msra.mxu1 %v5205_v18  ;;  %2763 = vmatprep.subr.bf16.mxu0 %v5210_v19  ;;  %v5277_v18 = vld [vmem:[%s6863_s3 + $0x928] ss:$16 sps:$4 sm:$0xff]   ;;  %v5282_v19 = vld [vmem:[%s6863_s3 + $0x944] ss:$16 sps:$4 sm:$0xff]  }
 0x1e1   : > { %2849 = vmatprep.subr.bf16.mxu1 %v5213_v20  ;;  %v5285_v20 = vld [vmem:[%s6863_s3 + $0x94c] ss:$16 sps:$4 sm:$0xff]  }
 0x1e3   : > { %2764 = vmatpush1.bf16.msra.mxu0 %v5208_v21  ;;  %v5280_v21 = vld [vmem:[%s6863_s3 + $0x940] ss:$16 sps:$4 sm:$0xff]  }
 0x1e4   : > { %2850 = vmatpush1.bf16.msra.mxu1 %v5211_v22  ;;  %2765 = vmatprep.subr.bf16.mxu0 %v5216_v23  ;;  %v5283_v22 = vld [vmem:[%s6863_s3 + $0x948] ss:$16 sps:$4 sm:$0xff]   ;;  %v5288_v23 = vld [vmem:[%s6863_s3 + $0x964] ss:$16 sps:$4 sm:$0xff]  }
 0x1e5   : > { %2851 = vmatprep.subr.bf16.mxu1 %v5219_v24  ;;  %v5286_v24 = vld [vmem:[%s6863_s3 + $0x960] ss:$16 sps:$4 sm:$0xff]  }
 0x1e7   : > { %2766 = vmatpush1.bf16.msra.mxu0 %v5214_v25  ;;  %v5294_v25 = vld [vmem:[%s6863_s3 + $0x984] ss:$16 sps:$4 sm:$0xff]  }
 0x1e8   : > { %2852 = vmatpush1.bf16.msra.mxu1 %v5217_v27  ;;  %3674 = vmatprep.subr.bf16.mxu0 %v5222_v29  ;;  %v5292_v27 = vld [vmem:[%s6863_s3 + $0x980] ss:$16 sps:$4 sm:$0xff]   ;;  %v5295_v29 = vld [vmem:[%s6863_s3 + $0x988] ss:$16 sps:$4 sm:$0xff]  }
 0x1e9   : > { %3760 = vmatprep.subr.bf16.mxu1 %v5225_v32  ;;  %v5303_v32 = vld [vmem:[%s6863_s3 + $0x9ac] ss:$16 sps:$4 sm:$0xff]  }
 0x1ea   : > { %2768 = vmatmul.mubr.bf16.vlgmr.msra.gmra.mrb[4].mxu0 %v912_v36 }
 0x1eb   : > { %2854 = vmatmul.mubr.bf16.vlgmr.msra.gmra.mrb[4].mxu1 %v912_v36  ;;  %3675 = vmatpush1.bf16.msra.mxu0 %v5220_v34  ;;  %v5301_v34 = vld [vmem:[%s6863_s3 + $0x9a8] ss:$16 sps:$4 sm:$0xff]   ;;  %v5309_v36 = vld [vmem:[%s6863_s3 + $0x9cc] ss:$16 sps:$4 sm:$0xff]  }
 0x1ec   : > { %3706 = vmatprep.mubr.bf16.mxu0 %v3023_v55  ;;  %3761 = vmatpush1.bf16.msra.mxu1 %v5223_v37  ;;  %v2868_v37 = vld [vmem:[#allocation3 + $0x40] sm:$0x3] }
 0x1ed   : > { %3792 = vmatprep.mubr.bf16.mxu1 %v3023_v55  ;;  %3676 = vmatprep.subr.bf16.mxu0 %v5228_v30  ;;  %v5307_v30 = vld [vmem:[%s6863_s3 + $0x9c8] ss:$16 sps:$4 sm:$0xff]  }
 0x1ee   : > { %3762 = vmatprep.subr.bf16.mxu1 %v5231_v39  ;;  %v5312_v39 = vld [vmem:[%s6863_s3 + $0x9e4] ss:$16 sps:$4 sm:$0xff]   ;;  %v2864_v55 = vld [vmem:[#allocation3] sm:$0xfc] }
 0x1ef   : > { %3677 = vmatpush1.bf16.msra.mxu0 %v5226_v40  ;;  %v5315_v40 = vld [vmem:[%s6863_s3 + $0x9ec] ss:$16 sps:$4 sm:$0xff]  }
 0x1f0   : > { %3763 = vmatpush1.bf16.msra.mxu1 %v5229_v41  ;;  %3678 = vmatprep.subr.bf16.mxu0 %v5234_v42  ;;  %v2876_v41 = vpack.c.bf16 %v2868_v37, %v2868_v37  ;;  %v5310_v42 = vld [vmem:[%s6863_s3 + $0x9e0] ss:$16 sps:$4 sm:$0xff]   ;;  %v5384_v37 = vld [vmem:[%s6863_s3 + $0xb64] ss:$16 sps:$4 sm:$0xff]  }
 0x1f1   : > { %3764 = vmatprep.subr.bf16.mxu1 %v5237_v43  ;;  %v5412_v43 = vld [vmem:[#allocation3 + $0x20] sm:$0xff] }
 0x1f3   : > { %3679 = vmatpush1.bf16.msra.mxu0 %v5232_v44  ;;  %v2872_v44 = vpack.c.bf16 %v5412_v43, %v2864_v55  ;;  %v5390_v55 = vld [vmem:[%s6863_s3 + $0xb84] ss:$16 sps:$4 sm:$0xff]  }
 0x1f4   : > { %3765 = vmatpush1.bf16.msra.mxu1 %v5235_v45  ;;  %3680 = vmatprep.subr.bf16.mxu0 %v5240_v46  ;;  %v5313_v45 = vld [vmem:[%s6863_s3 + $0x9e8] ss:$16 sps:$4 sm:$0xff]   ;;  %v5318_v46 = vld [vmem:[%s6863_s3 + $0xa04] ss:$16 sps:$4 sm:$0xff]  }
 0x1f5   : > { %3766 = vmatprep.subr.bf16.mxu1 %v5243_v47  ;;  %v3019_v47 = vrot.slane %v2876_v41, 1  ;;  %v5388_v41 = vld [vmem:[%s6863_s3 + $0xb80] ss:$16 sps:$4 sm:$0xff]   ;;  %v5396_v43 = vld [vmem:[%s6863_s3 + $0xba4] ss:$16 sps:$4 sm:$0xff]  }
 0x1f7   : > { %3681 = vmatpush1.bf16.msra.mxu0 %v5238_v48  ;;  %v5321_v48 = vld [vmem:[%s6863_s3 + $0xa0c] ss:$16 sps:$4 sm:$0xff]  }
 0x1f8   : > { %3767 = vmatpush1.bf16.msra.mxu1 %v5241_v6  ;;  %3682 = vmatprep.subr.bf16.mxu0 %v5246_v49  ;;  %v3018_v6 = vrot.slane %v2872_v44, 1  ;;  %v5316_v49 = vld [vmem:[%s6863_s3 + $0xa00] ss:$16 sps:$4 sm:$0xff]   ;;  %v5399_v44 = vld [vmem:[%s6863_s3 + $0xbac] ss:$16 sps:$4 sm:$0xff]  }
 0x1f9   : > { %3768 = vmatprep.subr.bf16.mxu1 %v5249_v50  ;;  %v5319_v50 = vld [vmem:[%s6863_s3 + $0xa08] ss:$16 sps:$4 sm:$0xff]  }
 0x1fb   : > { %3683 = vmatpush1.bf16.msra.mxu0 %v5244_v51  ;;  %v3020_v51 = vsel %vm3017_vm5, %v3018_v6, %v3019_v47  ;;  %v5402_v47 = vld [vmem:[%s6863_s3 + $0xbc4] ss:$16 sps:$4 sm:$0xff]   ;;  %v5400_v6 = vld [vmem:[%s6863_s3 + $0xbc0] ss:$16 sps:$4 sm:$0xff]  }
 0x1fc   : > { %3769 = vmatpush1.bf16.msra.mxu1 %v5247_v53  ;;  %3684 = vmatprep.subr.bf16.mxu0 %v5252_v54  ;;  %v5324_v53 = vld [vmem:[%s6863_s3 + $0xa24] ss:$16 sps:$4 sm:$0xff]   ;;  %v5327_v54 = vld [vmem:[%s6863_s3 + $0xa2c] ss:$16 sps:$4 sm:$0xff]  }
 0x1fd   : > { %3770 = vmatprep.subr.bf16.mxu1 %v5255_v56  ;;  %v5322_v56 = vld [vmem:[%s6863_s3 + $0xa20] ss:$16 sps:$4 sm:$0xff]  }
 0x1ff   : > { %3685 = vmatpush1.bf16.msra.mxu0 %v5250_v58  ;;  %v5325_v58 = vld [vmem:[%s6863_s3 + $0xa28] ss:$16 sps:$4 sm:$0xff]  }
 0x200   : > { %3771 = vmatpush1.bf16.msra.mxu1 %v5253_v60  ;;  %3686 = vmatprep.subr.bf16.mxu0 %v5258_v61  ;;  %v5330_v60 = vld [vmem:[%s6863_s3 + $0xa44] ss:$16 sps:$4 sm:$0xff]   ;;  %v5333_v61 = vld [vmem:[%s6863_s3 + $0xa4c] ss:$16 sps:$4 sm:$0xff]  }
 0x201   : > { %3772 = vmatprep.subr.bf16.mxu1 %v5261_v62  ;;  %v5328_v62 = vld [vmem:[%s6863_s3 + $0xa40] ss:$16 sps:$4 sm:$0xff]  }
 0x203   : > { %3687 = vmatpush1.bf16.msra.mxu0 %v5256_v63  ;;  %v5331_v63 = vld [vmem:[%s6863_s3 + $0xa48] ss:$16 sps:$4 sm:$0xff]  }
 0x204   : > { %3773 = vmatpush1.bf16.msra.mxu1 %v5259_v0  ;;  %3688 = vmatprep.subr.bf16.mxu0 %v5264_v5  ;;  %v5339_v0 = vld [vmem:[%s6863_s3 + $0xa6c] ss:$16 sps:$4 sm:$0xff]   ;;  %v5334_v5 = vld [vmem:[%s6863_s3 + $0xa60] ss:$16 sps:$4 sm:$0xff]  }
 0x205   : > { %3774 = vmatprep.subr.bf16.mxu1 %v5267_v7  ;;  %v5337_v7 = vld [vmem:[%s6863_s3 + $0xa68] ss:$16 sps:$4 sm:$0xff]  }
 0x207   : > { %3689 = vmatpush1.bf16.msra.mxu0 %v5262_v8  ;;  %v5342_v8 = vld [vmem:[%s6863_s3 + $0xa84] ss:$16 sps:$4 sm:$0xff]  }
 0x208   : > { %3775 = vmatpush1.bf16.msra.mxu1 %v5265_v9  ;;  %3690 = vmatprep.subr.bf16.mxu0 %v5270_v10  ;;  %v5345_v9 = vld [vmem:[%s6863_s3 + $0xa8c] ss:$16 sps:$4 sm:$0xff]   ;;  %v5340_v10 = vld [vmem:[%s6863_s3 + $0xa80] ss:$16 sps:$4 sm:$0xff]  }
 0x209   : > { %3776 = vmatprep.subr.bf16.mxu1 %v5273_v52  ;;  %v5343_v52 = vld [vmem:[%s6863_s3 + $0xa88] ss:$16 sps:$4 sm:$0xff]  }
 0x20b   : > { %3691 = vmatpush1.bf16.msra.mxu0 %v5268_v11  ;;  %v5348_v11 = vld [vmem:[%s6863_s3 + $0xaa4] ss:$16 sps:$4 sm:$0xff]  }
 0x20c   : > { %3777 = vmatpush1.bf16.msra.mxu1 %v5271_v12  ;;  %3692 = vmatprep.subr.bf16.mxu0 %v5276_v14  ;;  %v5351_v12 = vld [vmem:[%s6863_s3 + $0xaac] ss:$16 sps:$4 sm:$0xff]   ;;  %v5346_v14 = vld [vmem:[%s6863_s3 + $0xaa0] ss:$16 sps:$4 sm:$0xff]  }
 0x20d   : > { %3778 = vmatprep.subr.bf16.mxu1 %v5279_v15  ;;  %v5349_v15 = vld [vmem:[%s6863_s3 + $0xaa8] ss:$16 sps:$4 sm:$0xff]  }
 0x20f   : > { %3693 = vmatpush1.bf16.msra.mxu0 %v5274_v16  ;;  %v5354_v16 = vld [vmem:[%s6863_s3 + $0xac4] ss:$16 sps:$4 sm:$0xff]  }
 0x210   : > { %3779 = vmatpush1.bf16.msra.mxu1 %v5277_v18  ;;  %3694 = vmatprep.subr.bf16.mxu0 %v5282_v19  ;;  %v5357_v18 = vld [vmem:[%s6863_s3 + $0xacc] ss:$16 sps:$4 sm:$0xff]   ;;  %v5352_v19 = vld [vmem:[%s6863_s3 + $0xac0] ss:$16 sps:$4 sm:$0xff]  }
 0x211   : > { %3780 = vmatprep.subr.bf16.mxu1 %v5285_v20  ;;  %v5355_v20 = vld [vmem:[%s6863_s3 + $0xac8] ss:$16 sps:$4 sm:$0xff]  }
 0x213   : > { %3695 = vmatpush1.bf16.msra.mxu0 %v5280_v21  ;;  %v5360_v21 = vld [vmem:[%s6863_s3 + $0xae4] ss:$16 sps:$4 sm:$0xff]  }
 0x214   : > { %3781 = vmatpush1.bf16.msra.mxu1 %v5283_v22  ;;  %3696 = vmatprep.subr.bf16.mxu0 %v5288_v23  ;;  %v5363_v22 = vld [vmem:[%s6863_s3 + $0xaec] ss:$16 sps:$4 sm:$0xff]   ;;  %v5358_v23 = vld [vmem:[%s6863_s3 + $0xae0] ss:$16 sps:$4 sm:$0xff]  }
 0x215   : > { %3782 = vmatprep.subr.bf16.mxu1 %v5291_v28  ;;  %v5361_v28 = vld [vmem:[%s6863_s3 + $0xae8] ss:$16 sps:$4 sm:$0xff]  }
 0x217   : > { %3697 = vmatpush1.bf16.msra.mxu0 %v5286_v24  ;;  %v5366_v24 = vld [vmem:[%s6863_s3 + $0xb04] ss:$16 sps:$4 sm:$0xff]  }
 0x218   : > { %3783 = vmatpush1.bf16.msra.mxu1 %v5289_v59  ;;  %3698 = vmatprep.subr.bf16.mxu0 %v5294_v25  ;;  %v5369_v59 = vld [vmem:[%s6863_s3 + $0xb0c] ss:$16 sps:$4 sm:$0xff]   ;;  %v5364_v25 = vld [vmem:[%s6863_s3 + $0xb00] ss:$16 sps:$4 sm:$0xff]  }
 0x219   : > { %3784 = vmatprep.subr.bf16.mxu1 %v5297_v26  ;;  %v5367_v26 = vld [vmem:[%s6863_s3 + $0xb08] ss:$16 sps:$4 sm:$0xff]  }
 0x21b   : > { %3699 = vmatpush1.bf16.msra.mxu0 %v5292_v27  ;;  %v5372_v27 = vld [vmem:[%s6863_s3 + $0xb24] ss:$16 sps:$4 sm:$0xff]  }
 0x21c   : > { %3785 = vmatpush1.bf16.msra.mxu1 %v5295_v29  ;;  %3700 = vmatprep.subr.bf16.mxu0 %v5300_v31  ;;  %v5375_v29 = vld [vmem:[%s6863_s3 + $0xb2c] ss:$16 sps:$4 sm:$0xff]   ;;  %v5370_v31 = vld [vmem:[%s6863_s3 + $0xb20] ss:$16 sps:$4 sm:$0xff]  }
 0x21d   : > { %3786 = vmatprep.subr.bf16.mxu1 %v5303_v32  ;;  %v5373_v32 = vld [vmem:[%s6863_s3 + $0xb28] ss:$16 sps:$4 sm:$0xff]  }
 0x21f   : > { %3701 = vmatpush1.bf16.msra.mxu0 %v5298_v33  ;;  %v5378_v33 = vld [vmem:[%s6863_s3 + $0xb44] ss:$16 sps:$4 sm:$0xff]  }
 0x220   : > { %3787 = vmatpush1.bf16.msra.mxu1 %v5301_v34  ;;  %3702 = vmatprep.subr.bf16.mxu0 %v5306_v35  ;;  %v5381_v34 = vld [vmem:[%s6863_s3 + $0xb4c] ss:$16 sps:$4 sm:$0xff]   ;;  %v5376_v35 = vld [vmem:[%s6863_s3 + $0xb40] ss:$16 sps:$4 sm:$0xff]  }
 0x221   : > { %3788 = vmatprep.subr.bf16.mxu1 %v5309_v36  ;;  %v5379_v36 = vld [vmem:[%s6863_s3 + $0xb48] ss:$16 sps:$4 sm:$0xff]  }
 0x223   : > { %3703 = vmatpush1.bf16.msra.mxu0 %v5304_v38  ;;  %v5387_v38 = vld [vmem:[%s6863_s3 + $0xb6c] ss:$16 sps:$4 sm:$0xff]  }
 0x224   : > { %3789 = vmatpush1.bf16.msra.mxu1 %v5307_v30  ;;  %3704 = vmatprep.subr.bf16.mxu0 %v5312_v39  ;;  %v5382_v30 = vld [vmem:[%s6863_s3 + $0xb60] ss:$16 sps:$4 sm:$0xff]   ;;  %v5385_v39 = vld [vmem:[%s6863_s3 + $0xb68] ss:$16 sps:$4 sm:$0xff]  }
 0x225   : > { %3790 = vmatprep.subr.bf16.mxu1 %v5315_v40  ;;  %v5393_v40 = vld [vmem:[%s6863_s3 + $0xb8c] ss:$16 sps:$4 sm:$0xff]  }
 0x227   : > { %3705 = vmatpush1.bf16.msra.mxu0 %v5310_v42  ;;  %v5391_v42 = vld [vmem:[%s6863_s3 + $0xb88] ss:$16 sps:$4 sm:$0xff]  }
 0x228   : > { %3791 = vmatpush1.bf16.msra.mxu1 %v5313_v45  ;;  %3717 = vmatprep.subr.bf16.mxu0 %v5318_v46  ;;  %v5394_v45 = vld [vmem:[%s6863_s3 + $0xba0] ss:$16 sps:$4 sm:$0xff]   ;;  %v5397_v46 = vld [vmem:[%s6863_s3 + $0xba8] ss:$16 sps:$4 sm:$0xff]  }
 0x229   : > { %3803 = vmatprep.subr.bf16.mxu1 %v5321_v48  ;;  %v5405_v48 = vld [vmem:[%s6863_s3 + $0xbcc] ss:$16 sps:$4 sm:$0xff]  }
 0x22a   : > { %3707 = vmatmul.mubr.bf16.vlgmr.msra.gmra.mrb[4].mxu0 %v3020_v51 }
 0x22b   : > { %3793 = vmatmul.mubr.bf16.vlgmr.msra.gmra.mrb[4].mxu1 %v3020_v51  ;;  %3718 = vmatpush1.bf16.msra.mxu0 %v5316_v49  ;;  %v5403_v49 = vld [vmem:[%s6863_s3 + $0xbc8] ss:$16 sps:$4 sm:$0xff]   ;;  %v5411_v51 = vld [vmem:[%s6863_s3 + $0xbec] ss:$16 sps:$4 sm:$0xff]  }
 0x22c   : > { %3749 = vmatprep.mubr.bf16.mxu0 %v5906_v57  ;;  %3804 = vmatpush1.bf16.msra.mxu1 %v5319_v50  ;;  %v5408_v50 = vld [vmem:[%s6863_s3 + $0xbe4] ss:$16 sps:$4 sm:$0xff]  }
 0x22d   : > { %3835 = vmatprep.mubr.bf16.mxu1 %v5906_v57  ;;  %3719 = vmatprep.subr.bf16.mxu0 %v5324_v53  ;;  %v5336_v57 = vld [vmem:[%s6863_s3 + $0xa64] ss:$16 sps:$4 sm:$0xff]   ;;  %v5406_v53 = vld [vmem:[%s6863_s3 + $0xbe0] ss:$16 sps:$4 sm:$0xff]  }
 0x22e   : > { %3805 = vmatprep.subr.bf16.mxu1 %v5327_v54  ;;  %v5409_v54 = vld [vmem:[%s6863_s3 + $0xbe8] ss:$16 sps:$4 sm:$0xff]  }
 0x22f   : > { %3720 = vmatpush1.bf16.msra.mxu0 %v5322_v56  ;;  %v3854_v56 = vld [vmem:[%s6864_s4] sm:$0xf] }
 0x230   : > { %3806 = vmatpush1.bf16.msra.mxu1 %v5325_v58  ;;  %3721 = vmatprep.subr.bf16.mxu0 %v5330_v60  ;;  %v3859_v58 = vrot.slane %v3854_v56, %v814_v2  ;;  %v3867_v60 = vrot.slane %v3854_v56, %v822_v13 }
 0x231   : > { %3807 = vmatprep.subr.bf16.mxu1 %v5333_v61  ;;  %v3863_v61 = vrot.slane %v3854_v56, %v818_v4 }
 0x233   : > { %3722 = vmatpush1.bf16.msra.mxu0 %v5328_v62  ;;  %v3871_v62 = vrot.slane %v3854_v56, %v826_v17 }
 0x234   : > { %3808 = vmatpush1.bf16.msra.mxu1 %v5331_v63  ;;  %3723 = vmatprep.subr.bf16.mxu0 %v5336_v57 }
 0x235   : > { %3809 = vmatprep.subr.bf16.mxu1 %v5339_v0 }
 0x237   : > { %3724 = vmatpush1.bf16.msra.mxu0 %v5334_v5 }
 0x238   : > { %3810 = vmatpush1.bf16.msra.mxu1 %v5337_v7  ;;  %3725 = vmatprep.subr.bf16.mxu0 %v5342_v8 }
 0x239   : > { %3811 = vmatprep.subr.bf16.mxu1 %v5345_v9 }
 0x23b   : > { %3726 = vmatpush1.bf16.msra.mxu0 %v5340_v10 }
 0x23c   : > { %3812 = vmatpush1.bf16.msra.mxu1 %v5343_v52  ;;  %3727 = vmatprep.subr.bf16.mxu0 %v5348_v11 }
 0x23d   : > { %3813 = vmatprep.subr.bf16.mxu1 %v5351_v12 }
 0x23f   : > { %3728 = vmatpush1.bf16.msra.mxu0 %v5346_v14 }
 0x240   : > { %3814 = vmatpush1.bf16.msra.mxu1 %v5349_v15  ;;  %3729 = vmatprep.subr.bf16.mxu0 %v5354_v16 }
 0x241   : > { %3815 = vmatprep.subr.bf16.mxu1 %v5357_v18 }
 0x243   : > { %3730 = vmatpush1.bf16.msra.mxu0 %v5352_v19 }
 0x244   : > { %3816 = vmatpush1.bf16.msra.mxu1 %v5355_v20  ;;  %3731 = vmatprep.subr.bf16.mxu0 %v5360_v21 }
 0x245   : > { %3817 = vmatprep.subr.bf16.mxu1 %v5363_v22 }
 0x247   : > { %3732 = vmatpush1.bf16.msra.mxu0 %v5358_v23 }
 0x248   : > { %3818 = vmatpush1.bf16.msra.mxu1 %v5361_v28  ;;  %3733 = vmatprep.subr.bf16.mxu0 %v5366_v24 }
 0x249   : > { %3819 = vmatprep.subr.bf16.mxu1 %v5369_v59 }
 0x24b   : > { %3734 = vmatpush1.bf16.msra.mxu0 %v5364_v25 }
 0x24c   : > { %3820 = vmatpush1.bf16.msra.mxu1 %v5367_v26  ;;  %3735 = vmatprep.subr.bf16.mxu0 %v5372_v27 }
 0x24d   : > { %3821 = vmatprep.subr.bf16.mxu1 %v5375_v29 }
 0x24f   : > { %3736 = vmatpush1.bf16.msra.mxu0 %v5370_v31 }
 0x250   : > { %3822 = vmatpush1.bf16.msra.mxu1 %v5373_v32  ;;  %3737 = vmatprep.subr.bf16.mxu0 %v5378_v33 }
 0x251   : > { %3823 = vmatprep.subr.bf16.mxu1 %v5381_v34 }
 0x253   : > { %3738 = vmatpush1.bf16.msra.mxu0 %v5376_v35 }
 0x254   : > { %3824 = vmatpush1.bf16.msra.mxu1 %v5379_v36  ;;  %3739 = vmatprep.subr.bf16.mxu0 %v5384_v37 }
 0x255   : > { %3825 = vmatprep.subr.bf16.mxu1 %v5387_v38 }
 0x257   : > { %3740 = vmatpush1.bf16.msra.mxu0 %v5382_v30 }
 0x258   : > { %3826 = vmatpush1.bf16.msra.mxu1 %v5385_v39  ;;  %3741 = vmatprep.subr.bf16.mxu0 %v5390_v55 }
 0x259   : > { %3827 = vmatprep.subr.bf16.mxu1 %v5393_v40 }
 0x25b   : > { %3742 = vmatpush1.bf16.msra.mxu0 %v5388_v41 }
 0x25c   : > { %3828 = vmatpush1.bf16.msra.mxu1 %v5391_v42  ;;  %3743 = vmatprep.subr.bf16.mxu0 %v5396_v43 }
 0x25d   : > { %3829 = vmatprep.subr.bf16.mxu1 %v5399_v44 }
 0x25f   : > { %3744 = vmatpush1.bf16.msra.mxu0 %v5394_v45 }
 0x260   : > { %3830 = vmatpush1.bf16.msra.mxu1 %v5397_v46  ;;  %3745 = vmatprep.subr.bf16.mxu0 %v5402_v47 }
 0x261   : > { %3831 = vmatprep.subr.bf16.mxu1 %v5405_v48 }
 0x263   : > { %3746 = vmatpush1.bf16.msra.mxu0 %v5400_v6 }
 0x264   : > { %3832 = vmatpush1.bf16.msra.mxu1 %v5403_v49  ;;  %3747 = vmatprep.subr.bf16.mxu0 %v5408_v50 }
 0x265   : > { %3833 = vmatprep.subr.bf16.mxu1 %v5411_v51 }
 0x267   : > { %3748 = vmatpush1.bf16.msra.mxu0 %v5406_v53 }
 0x268   : > { %3834 = vmatpush1.bf16.msra.mxu1 %v5409_v54 }
 0x26a   : > { %3750 = vmatmul.mubr.bf16.vlgmr.msra.gmra.mrb[4].mxu0 %v5921_v3 }
 0x26b   : > { %3836 = vmatmul.mubr.bf16.vlgmr.msra.gmra.mrb[4].mxu1 %v5921_v3 }
 0x33d   : > { %v3751_v63 = vpop.f32.mrb[4].mxu0 }
 0x33e   : > { %v3876_v57 = vadd.f32 %v3859_v58, %v3751_v63  ;;  %v3837_v3 = vpop.f32.mrb[4].mxu1  ;;  %v3753_v0 = vpop.f32.mrb[5].mxu0 }
 0x33f   : > { %v3878_v5 = vadd.f32 %v3867_v60, %v3837_v3  ;;  %v3877_v2 = vadd.f32 %v3863_v61, %v3753_v0  ;;  %v3839_v7 = vpop.f32.mrb[5].mxu1  ;;  %v3755_v8 = vpop.f32.mrb[6].mxu0 }
 0x340   : > { %v3884_v13 = vmax.f32 %v3876_v57, 0.0  ;;  %v3879_v9 = vadd.f32 %v3871_v62, %v3839_v7  ;;  %v3880_v10 = vadd.f32 %v3859_v58, %v3755_v8  ;;  %v3841_v4 = vpop.f32.mrb[6].mxu1  ;;  %v3757_v52 = vpop.f32.mrb[7].mxu0 }
 0x341   : > { %v3886_v11 = vmax.f32 %v3878_v5, 0.0  ;;  %v3885_v1 = vmax.f32 %v3877_v2, 0.0  ;;  %v3882_v17 = vadd.f32 %v3867_v60, %v3841_v4  ;;  %v3881_v12 = vadd.f32 %v3863_v61, %v3757_v52  ;;  %v3843_v14 = vpop.f32.mrb[7].mxu1 }
 0x342   : > { %3892 = vst [vmem:[%s224_s21] sm:$0xff] %v3884_v13  ;;  %v3887_v15 = vmax.f32 %v3879_v9, 0.0  ;;  %v3888_v16 = vmax.f32 %v3880_v10, 0.0  ;;  %v3883_v18 = vadd.f32 %v3871_v62, %v3843_v14 }
 0x343   : > { %3894 = vst [vmem:[%s224_s21 + $0x10] sm:$0xff] %v3886_v11  ;;  %3893 = vst [vmem:[%s224_s21 + $0x8] sm:$0xff] %v3885_v1  ;;  %v3890_v19 = vmax.f32 %v3882_v17, 0.0  ;;  %v3889_v20 = vmax.f32 %v3881_v12, 0.0 }
 0x344   : > { %3895 = vst [vmem:[%s224_s21 + $0x18] sm:$0xff] %v3887_v15  ;;  %3896 = vst [vmem:[%s224_s21 + $0x20] sm:$0xff] %v3888_v16  ;;  %v3891_v21 = vmax.f32 %v3883_v18, 0.0 }
 0x345   : > { %3898 = vst [vmem:[%s224_s21 + $0x30] sm:$0xff] %v3890_v19  ;;  %3897 = vst [vmem:[%s224_s21 + $0x28] sm:$0xff] %v3889_v20 }
 0x346   : > { %3899 = vst [vmem:[%s224_s21 + $0x38] sm:$0xff] %v3891_v21 }
 0x347 PF: > { %s15_s18 = sadd.s32 1, %s5419_s18  }
 0x348   : > { %p12_p4 = scmp.ge.s32.totalorder %s15_s18, 4  }
 0x34a   :  { %14 = sbr.rel (!%p12_p4) target bundleno = 1 (0x1), region = 75 }

</bundles_post_ra>
